<compile_context>
chip_gen: v6e
topology: v6e:2x2x1
jax: 0.10.0
libtpu: 0.0.40
codegen_flags: <defaults>
</compile_context>

<pallas_src>
import math

import jax
import jax.numpy as jnp
from jax.experimental import pallas as pl
from jax.experimental.pallas import tpu as pltpu

_LANE = 128
_SUBLANE_32BIT = 8
_TARGET_TILE_BYTES = 2 * 1024 * 1024   # per VMEM buffer (4 live buffers ~ 8 MiB)
_MIN_PALLAS_BYTES = 1 * 1024 * 1024    # below this, let XLA fuse the multiply
_VMEM_LIMIT_BYTES = 32 * 1024 * 1024   # explicit, reproducible across v5e/v6e/v7x


def _cdiv(a, b):
    return -(-a // b)


def _drop_path_kernel(scale_ref, x_ref, o_ref):
    """o = x * scale, scale broadcast along lanes (per-sample mask/keep_prob)."""
    # scale_ref: VMEM (TB, 1) f32 ; x_ref / o_ref: VMEM (TB, TC) tiles.
    o_ref[...] = x_ref[...] * scale_ref[...].astype(o_ref.dtype)


def _choose_tiles(B, F, itemsize):
    """(TB, TC): full (8/16,128)-multiple vreg tiles, ~2 MiB per buffer."""
    # Sublane packing: 8 rows for 32-bit, 16 for 16-bit, 32 for 8-bit dtypes.
    sublane = _SUBLANE_32BIT * max(1, 4 // itemsize)
    tb = min(B, sublane)                 # divisible by 8, or == full batch dim

    if F < _LANE:
        tc = F                           # block dim == array dim: always legal
    else:
        target = max(_LANE,
                     (_TARGET_TILE_BYTES // (tb * itemsize)) // _LANE * _LANE)
        tc = min(target, (F // _LANE) * _LANE)   # 128-aligned, <= F

    # Keep at least ~4 blocks so both v7x TensorCores stay busy.
    while _cdiv(B, tb) * _cdiv(F, tc) < 4 and tc > _LANE:
        tc = max(_LANE, (tc // 2) // _LANE * _LANE)
    return tb, tc


def drop_path_pallas(x, drop_prob, training, key):
    """Pallas equivalent of `drop_path(x, drop_prob, training)`."""
    if drop_prob == 0.0 or not training:
        return x

    keep_prob = 1.0 - drop_prob
    B = x.shape[0]
    F = int(math.prod(x.shape[1:]))

    # random_tensor = floor(keep_prob + U[0,1)) -> Bernoulli(keep_prob) per sample;
    # fold the mask with 1/keep_prob into a single f32 scale vector.
    rand = jax.random.uniform(key, (B,), dtype=jnp.float32)
    mask = jnp.floor(keep_prob + rand)               # (B,) of 0.0 / 1.0
    scale = mask * (1.0 / keep_prob)                 # (B,) f32

    itemsize = jnp.dtype(x.dtype).itemsize

    # Small activations: broadcast multiply fuses for free in XLA; a standalone
    # pallas_call would be dominated by launch + per-step pipeline overhead.
    if B * F * itemsize < _MIN_PALLAS_BYTES:
        bshape = (B,) + (1,) * (x.ndim - 1)
        return (x * scale.reshape(bshape).astype(x.dtype)).astype(x.dtype)

    x2 = x.reshape(B, F)                             # contiguous -> free reshape
    scale2 = scale.reshape(B, 1)

    tb, tc = _choose_tiles(B, F, itemsize)
    grid = (_cdiv(B, tb), _cdiv(F, tc))

    out2 = pl.pallas_call(
        _drop_path_kernel,
        out_shape=jax.ShapeDtypeStruct((B, F), x.dtype),
        grid=grid,
        in_specs=[
            pl.BlockSpec((tb, 1), lambda b, c: (b, 0)),    # per-sample scale
            pl.BlockSpec((tb, tc), lambda b, c: (b, c)),   # activation tile
        ],
        out_specs=pl.BlockSpec((tb, tc), lambda b, c: (b, c)),
        input_output_aliases={1: 0},                       # write x in place
        compiler_params=pltpu.CompilerParams(
            dimension_semantics=("parallel", "parallel"),
            vmem_limit_bytes=_VMEM_LIMIT_BYTES),
        cost_estimate=pl.CostEstimate(
            flops=B * F,
            transcendentals=0,
            bytes_accessed=2 * B * F * itemsize + B * 4),
    )(scale2, x2)

    return out2.reshape(x.shape)


class DropPath:
    """Drop paths (Stochastic Depth) per sample — Pallas-backed."""

    def __init__(self, drop_prob=0.0):
        self.drop_prob = drop_prob
        self.training = True

    def __call__(self, x, key):
        return drop_path_pallas(x, self.drop_prob, self.training, key)


if __name__ == "__main__":
    root = jax.random.PRNGKey(0)
    k_small, k_big, k_rag, k_drop = jax.random.split(root, 4)

    module = DropPath(drop_prob=0.25)
    keep_prob = 1.0 - module.drop_prob

    def reference(x, key):
        rand = jax.random.uniform(key, (x.shape[0],), dtype=jnp.float32)
        mask = jnp.floor(keep_prob + rand).reshape(
            (x.shape[0],) + (1,) * (x.ndim - 1))
        return (x / keep_prob * mask.astype(x.dtype)).astype(x.dtype)

    # 1) Small activation (B=2, N=8, D=32): XLA fallback path.
    x_small = jax.random.normal(k_small, (2, 8, 32), dtype=jnp.float32)
    out_small = jax.block_until_ready(module(x_small, k_drop))
    assert out_small.shape == x_small.shape and out_small.dtype == x_small.dtype
    assert jnp.allclose(out_small, reference(x_small, k_drop), atol=1e-6, rtol=1e-5)

    # 2) ViT-Base-like tokens (Pallas path, f32, (8, TC) blocks).
    x_big = jax.random.normal(k_big, (8, 197, 768), dtype=jnp.float32)
    out_big = jax.block_until_ready(module(x_big, k_drop))
    assert out_big.shape == x_big.shape and out_big.dtype == x_big.dtype
    assert jnp.allclose(out_big, reference(x_big, k_drop), atol=1e-5, rtol=1e-5)

    # 3) Same tokens in bf16 (Pallas path, in-dtype math).
    x_bf16 = x_big.astype(jnp.bfloat16)
    out_bf16 = jax.block_until_ready(module(x_bf16, k_drop))
    assert out_bf16.dtype == jnp.bfloat16
    assert jnp.allclose(out_bf16.astype(jnp.float32),
                        reference(x_bf16, k_drop).astype(jnp.float32),
                        atol=2e-2, rtol=2e-2)

    # 4) Ragged feature dim (F % 128 != 0): Pallas path with masked edge blocks.
    x_rag = jax.random.normal(k_rag, (16, 300, 65), dtype=jnp.float32)
    out_rag = jax.block_until_ready(module(x_rag, k_drop))
    assert out_rag.shape == x_rag.shape
    assert jnp.allclose(out_rag, reference(x_rag, k_drop), atol=1e-5, rtol=1e-5)

    # 5) Eval mode is the identity.
    module.training = False
    out_eval = jax.block_until_ready(module(x_small, k_drop))
    assert jnp.array_equal(out_eval, x_small)

    print("KERNEL_OK")
</pallas_src>

<mosaic_0001>
module attributes {stable_mosaic.version = 11 : i64} {
  func.func @_drop_path_kernel(%arg0: i32, %arg1: i32, %arg2: memref<8x1xf32, #tpu.memory_space<vmem>>, %arg3: memref<8x32768xf32, #tpu.memory_space<vmem>>, %arg4: memref<8x32768xf32, #tpu.memory_space<vmem>>) attributes {dimension_semantics = [#tpu.dimension_semantics<parallel>, #tpu.dimension_semantics<parallel>], iteration_bounds = array<i64: 1, 5>, scalar_prefetch = 0 : i64, scratch_operands = 0 : i64, tpu.core_type = #tpu.core_type<tc>, window_params = [{transform_indices = @transform_0, window_bounds = array<i64: 8, 1>}, {transform_indices = @transform_1, window_bounds = array<i64: 8, 32768>}, {transform_indices = @transform_2, window_bounds = array<i64: 8, 32768>}]} {
    %c0 = arith.constant 0 : index
    %c0_0 = arith.constant 0 : index
    %0 = vector.load %arg3[%c0, %c0_0] : memref<8x32768xf32, #tpu.memory_space<vmem>>, vector<8x32768xf32>
    %c0_1 = arith.constant 0 : index
    %c0_2 = arith.constant 0 : index
    %1 = vector.load %arg2[%c0_1, %c0_2] : memref<8x1xf32, #tpu.memory_space<vmem>>, vector<8x1xf32>
    %2 = vector.broadcast %1 : vector<8x1xf32> to vector<8x32768xf32>
    %3 = arith.mulf %0, %2 : vector<8x32768xf32>
    %c0_3 = arith.constant 0 : index
    %c0_4 = arith.constant 0 : index
    %4 = vector.load %arg4[%c0_3, %c0_4] : memref<8x32768xf32, #tpu.memory_space<vmem>>, vector<8x32768xf32>
    tpu.vector_store %arg4[%c0_3, %c0_4], %3 {strides = array<i32>} : memref<8x32768xf32, #tpu.memory_space<vmem>>, vector<8x32768xf32>,
    return
  }
  func.func @transform_0(%arg0: i32, %arg1: i32) -> (i32, i32) {
    %c0_i32 = arith.constant 0 : i32
    %c0_i32_0 = arith.constant 0 : i32
    return %arg0, %c0_i32 : i32, i32
  }
  func.func @transform_1(%arg0: i32, %arg1: i32) -> (i32, i32) {
    %c0_i32 = arith.constant 0 : i32
    return %arg0, %arg1 : i32, i32
  }
  func.func @transform_2(%arg0: i32, %arg1: i32) -> (i32, i32) {
    %c0_i32 = arith.constant 0 : i32
    return %arg0, %arg1 : i32, i32
  }
}

</mosaic_0001>

<bundles_post_ra>
// kernel: tpu_custom_call.1
= control target key start
LH: loop header
LB: loop body
LE: loop exit
PB: predicated region body
PF: predicated region fallthrough
CT: control target
= control target key end

     0   :  { %7 = vsyncpa [#allocation3], 0  ;;  %s2811_s0 = inlined_call_operand.vmem [shape: f32[8,1], index: 0, kind: input, shape index: {}]   ;;  %s2812_s1 = inlined_call_operand.hbm [shape: f32[8,151296], index: 1, kind: input, shape index: {}, may-alias: {1,2}]   ;;  %s2813_s2 = inlined_call_operand.hbm [shape: f32[8,151296], index: 2, kind: output, shape index: {}, may-alias: {1,2}]  }
   0x1   :  { %9 = vsyncpa [#allocation3 + $0x1], 0 }
   0x2   :  { %10 = vsyncpa [#allocation4], 0 }
   0x3   :  { %12 = vsyncpa [#allocation4 + $0x1], 0  ;;  %s1316_s9 = smov 0   ;;  %s1318_s10 = smov 0  }
   0x4   :  { %s1320_s11 = smov 0   ;;  %s1322_s12 = smov 0  }
   0x5   :  { %s1324_s13 = smov 0   ;;  %s1326_s14 = smov 0  }
   0x6 LB: > { %s1107_s15 = sadd.s32 4294967295, %s1296_s14   ;;  %s1108_s16 = sadd.s32 4294967294, %s1296_s14   ;;  %s1296_s14 = sphi %s1326_s14, %s18_s14   ;;  %s1292_s13 = sphi %s1324_s13, %s2821_s13   ;;  %s1288_s12 = sphi %s1322_s12, %s2820_s12   ;;  %s1284_s11 = sphi %s1320_s11, %s2819_s11   ;;  %s1280_s10 = sphi %s1318_s10, %s2818_s10   ;;  %s1276_s9 = sphi %s1316_s9, %s2817_s9  }
   0x7   : > { %s27_s17 = sadd.s32 1, %s1292_s13  ;;  %s65_s18 = sadd.s32 1, %s1284_s11 }
   0x8   : > { %p28_p0 = scmp.ge.s32.totalorder %s27_s17, 5  ;;  %p72_p1 = scmp.ne.s32.totalorder %s1284_s11, %s1280_s10 }
   0x9   : > { %p73_p2 = scmp.eq.s32.totalorder %s1296_s14, 0  ;;  %p78_p3 = scmp.ne.s32.totalorder %s1280_s10, %s1276_s9 }
   0xa   : > { %s2823_s17 = smov (%p28_p0, %s27_s17), 0  ;;  %p79_p5 = scmp.eq.s32.totalorder %s1107_s15, 0 }
   0xb   : > { %p74_p4 = por %p73_p2, %p72_p1  ;;  %s61_s19 = ssub.s32 %s1292_s13, %s2823_s17 }
   0xc   : > { %p104_p6 = scmp.eq.s32.totalorder %s1107_s15, 4  ;;  %p63_p7 = scmp.eq.s32.totalorder %s61_s19, 0 }
   0xd   : > { %p1359_p8 = por %p79_p5, %p78_p3  ;;  %p110_p10 = scmp.eq.s32.totalorder %s1108_s16, 4 }
   0xe   : > { %p1363_p9 = por %p104_p6, %p72_p1  ;;  %p1111_p12 = scmp.ge.s32.totalorder %s1296_s14, 5 }
   0xf   : > { %s1368_s22 = scalar_select %p63_p7, %s1284_s11, %s65_s18  }
  0x10   : > { %p1370_p11 = por %p110_p10, %p78_p3  ;;  %133 = sbr.rel (%p1111_p12) target bundleno = 52 (0x34), region = 20 }
  0x15   : > { %136 = sbr.rel (!%p74_p4) target bundleno = 52 (0x34), region = 24  ;;  %s137_s24 = sand.u32 (%p74_p4), 1, %s1284_s11  }
  0x16   : > { %s1113_s25 = sshll.u32 (%p74_p4), %s1292_s13, 8  ;;  %s1112_s26 = sshll.u32 (%p74_p4), %s137_s24, 11 }
  0x17   : > { %s143_s27 = ssub.s32 (%p74_p4), 1182, %s1113_s25  ;;  %s1380_s30 = scalar_lea.sflag (%p74_p4), [#allocation3], %s137_s24 }
  0x18   : > { %p144_p13 = scmp.lt.s32.totalorder (%p74_p4), %s143_s27, 256  ;;  %s141_s3 = scalar_lea.vmem (%p74_p4), [#allocation2], %s1112_s26 }
  0x1a   : > { %s2825_s27 = smov (!%p144_p13, %s143_s27), 256 }
  0x1b   : > { %s1377_s28 = sshll.u32 %s2825_s27, 7 }
  0x1c   : > { %s148_s29 = ssub.s32 32768, %s1377_s28 }
  0x1d   : > { %149 = vsyncadd %s1380_s30, %s148_s29  ;;  %p1115_p0 = scmp.ne.s32.totalorder %s1377_s28, 0  ;;  %s1131_s4 = sshll.u32 %s1292_s13, 15 }
  0x1e   : > { %s154_s7 = scalar_lea.hbm %s2812_s1, %s1131_s4  ;;  %s157_s8 = sshll.u32 %s141_s3, 4  ;;  %s158_s8 = int_to_ptr.vmem [resolvable:$true] %s157_s8 }
  0x1f   : > { %s1190_s15 = scalar_lea.hbm %s154_s7, %s1377_s28  ;;  %s1194_s19 = scalar_lea.hbm %s2812_s1, 151296 }
  0x20   : > { %p1191_p1 = scmp.ne.s32.totalorder %s154_s7, %s1190_s15  ;;  %p1196_p4 = scmp.lt.s32.totalorder %s1194_s19, %s1190_s15 }
  0x22   : > { %p1192_p2 = pnand %p1191_p1, %p1115_p0 }
  0x24   : > { %p1193_p3 = pneg %p1192_p2 }
  0x26   : > { %p1198_p5 = pnand %p1196_p4, %p1193_p3 }
  0x28   : > { %1201 = shalt.err (!%p1198_p5)
}
  0x29   : > { %s1202_s24 = scalar_lea.vmem %s158_s8, %s1377_s28  ;;  %s1298_s25 = smov [#allocation2]  }
  0x2a   : > { %p1203_p6 = scmp.ne.s32.totalorder %s158_s8, %s1202_s24  ;;  %s1206_s26 = sshll.u32 %s1298_s25, 4  ;;  %s1207_s26 = int_to_ptr.vmem [resolvable:$false] %s1206_s26 }
  0x2b   : > { %s1208_s27 = scalar_lea.vmem %s1207_s26, 65536  ;;  %p1209_p12 = scmp.lt.s32.totalorder %s158_s8, %s1207_s26 }
  0x2c   : > { %p1204_p7 = pnand %p1203_p6, %p1115_p0  ;;  %p1210_p13 = scmp.lt.s32.totalorder %s1208_s27, %s1202_s24 }
  0x2e   : > { %p1205_p10 = pneg %p1204_p7  ;;  %p1211_p1 = por %p1210_p13, %p1209_p12 }
  0x30   : > { %p1212_p2 = pnand %p1211_p1, %p1205_p10 }
  0x32   : > { %1215 = shalt.err (!%p1212_p2)
}
  0x33   : > { %160 = dma.hbm_to_vmem [thread:$0]  (%p1115_p0), %s154_s7, %s1377_s28, %s158_s8, %s1380_s30  }
  0x34 PF: > { %p1119_p3 = scmp.ge.s32.totalorder %s1296_s14, 1  ;;  %p162_p4 = scmp.lt.s32.totalorder %s1296_s14, 6 }
  0x36   : > { %p163_p5 = pnand %p1119_p3, %p162_p4 }
  0x37   : > { %s1404_s29 = sand.u32 (!%p163_p5), 1, %s1280_s10  }
  0x38   : > { %166 = sbr.rel (%p163_p5) target bundleno = 345 (0x159), region = 28  ;;  %s1120_s3 = sshll.u32 (!%p163_p5), %s1404_s29, 11 }
  0x39   : > { %s169_s4 = scalar_lea.sflag (!%p163_p5), [#allocation3], %s1404_s29  ;;  %s1410_s5 = scalar_lea.vmem (!%p163_p5), [#allocation2], %s1120_s3 }
  0x3d   : > { %1267 = dma.done.wait (%p1359_p8), %s169_s4, 32768  }
  0x3e   : > { %1269 = vsyncadd (%p1359_p8), %s169_s4, 4294934528  ;;  %v1299_v0 = vmov 0   ;;  %v467_v1 = vld [vmem:[%s2811_s0] sm:$0xff]  ;;  %v212_v3 = vld [vmem:[%s1410_s5 + $0x8] sm:$0xff]  ;;  %s1475_s20 = scalar_lea.vmem [#allocation5], %s1120_s3  ;;  %s986_s6 = scalar_lea.sflag [#allocation4], %s1404_s29 }
  0x3f   : > { %1189 = vset.pattern.permute.xlu0 %v1299_v0  ;;  %v211_v2 = vld [vmem:[%s1410_s5] sm:$0xff]  ;;  %v213_v4 = vld [vmem:[%s1410_s5 + $0x10] sm:$0xff]  ;;  %v214_v5 = vld [vmem:[%s1410_s5 + $0x18] sm:$0xff]  ;;  %s1123_s7 = sshll.u32 (%p1363_p9), %s1288_s12, 8 }
  0x40   : > { %470 = vperm.xlu0 %1189, %v467_v1   ;;  %v215_v6 = vld [vmem:[%s1410_s5 + $0x20] sm:$0xff]  ;;  %v216_v7 = vld [vmem:[%s1410_s5 + $0x28] sm:$0xff]  ;;  %v217_v8 = vld [vmem:[%s1410_s5 + $0x30] sm:$0xff]  ;;  %s994_s8 = ssub.s32 (%p1363_p9), 1182, %s1123_s7 }
  0x41   : > { %v218_v9 = vld [vmem:[%s1410_s5 + $0x38] sm:$0xff]  ;;  %v219_v10 = vld [vmem:[%s1410_s5 + $0x40] sm:$0xff]  ;;  %v220_v11 = vld [vmem:[%s1410_s5 + $0x48] sm:$0xff]  ;;  %p995_p8 = scmp.lt.s32.totalorder (%p1363_p9), %s994_s8, 256 }
  0x42   : > { %v221_v12 = vld [vmem:[%s1410_s5 + $0x50] sm:$0xff]  ;;  %v222_v13 = vld [vmem:[%s1410_s5 + $0x58] sm:$0xff]  ;;  %v223_v14 = vld [vmem:[%s1410_s5 + $0x60] sm:$0xff] }
  0x43   : > { %v224_v15 = vld [vmem:[%s1410_s5 + $0x68] sm:$0xff]  ;;  %v225_v16 = vld [vmem:[%s1410_s5 + $0x70] sm:$0xff]  ;;  %v226_v17 = vld [vmem:[%s1410_s5 + $0x78] sm:$0xff] }
  0x44   : > { %v227_v19 = vld [vmem:[%s1410_s5 + $0x80] sm:$0xff]  ;;  %v228_v20 = vld [vmem:[%s1410_s5 + $0x88] sm:$0xff]  ;;  %v229_v21 = vld [vmem:[%s1410_s5 + $0x90] sm:$0xff] }
  0x45   : > { %v230_v22 = vld [vmem:[%s1410_s5 + $0x98] sm:$0xff]  ;;  %v231_v23 = vld [vmem:[%s1410_s5 + $0xa0] sm:$0xff]  ;;  %v232_v24 = vld [vmem:[%s1410_s5 + $0xa8] sm:$0xff] }
  0x46   : > { %v233_v25 = vld [vmem:[%s1410_s5 + $0xb0] sm:$0xff]  ;;  %v234_v26 = vld [vmem:[%s1410_s5 + $0xb8] sm:$0xff]  ;;  %v235_v31 = vld [vmem:[%s1410_s5 + $0xc0] sm:$0xff] }
  0x47   : > { %v236_v32 = vld [vmem:[%s1410_s5 + $0xc8] sm:$0xff]  ;;  %v237_v33 = vld [vmem:[%s1410_s5 + $0xd0] sm:$0xff]  ;;  %v238_v34 = vld [vmem:[%s1410_s5 + $0xd8] sm:$0xff] }
  0x48   : > { %v1458_v39 = vld [vmem:[%s1410_s5 + $0xe0] sm:$0xff]  ;;  %v1461_v40 = vld [vmem:[%s1410_s5 + $0xe8] sm:$0xff]  ;;  %v1464_v41 = vld [vmem:[%s1410_s5 + $0xf0] sm:$0xff] }
  0x49   : > { %v1467_v42 = vld [vmem:[%s1410_s5 + $0xf8] sm:$0xff]  ;;  %v1482_v47 = vld [vmem:[%s1410_s5 + $0x100] sm:$0xff]  ;;  %v1485_v48 = vld [vmem:[%s1410_s5 + $0x108] sm:$0xff] }
  0x4a   : > { %v1488_v49 = vld [vmem:[%s1410_s5 + $0x110] sm:$0xff]  ;;  %v1491_v50 = vld [vmem:[%s1410_s5 + $0x118] sm:$0xff]  ;;  %v1502_v55 = vld [vmem:[%s1410_s5 + $0x120] sm:$0xff] }
  0x4b   : > { %v1505_v56 = vld [vmem:[%s1410_s5 + $0x128] sm:$0xff]  ;;  %v1508_v57 = vld [vmem:[%s1410_s5 + $0x130] sm:$0xff]  ;;  %v1511_v58 = vld [vmem:[%s1410_s5 + $0x138] sm:$0xff] }
  0x4c   : > { %v1522_v63 = vld [vmem:[%s1410_s5 + $0x140] sm:$0xff]  ;;  %v1525_v0 = vld [vmem:[%s1410_s5 + $0x148] sm:$0xff]  ;;  %v1528_v1 = vld [vmem:[%s1410_s5 + $0x150] sm:$0xff] }
  0xbb   : > { %v1435_v18 = vpop.permute.xlu0 %470 }
  0xbc   : > { %v473_v27 = vmul.f32 %v1435_v18, %v211_v2  ;;  %v474_v28 = vmul.f32 %v1435_v18, %v212_v3  ;;  %v475_v29 = vmul.f32 %v1435_v18, %v213_v4  ;;  %v476_v30 = vmul.f32 %v1435_v18, %v214_v5  ;;  %v1531_v2 = vld [vmem:[%s1410_s5 + $0x158] sm:$0xff] }
  0xbd   : > { %v477_v35 = vmul.f32 %v1435_v18, %v215_v6  ;;  %v478_v36 = vmul.f32 %v1435_v18, %v216_v7  ;;  %v479_v37 = vmul.f32 %v1435_v18, %v217_v8  ;;  %v480_v38 = vmul.f32 %v1435_v18, %v218_v9  ;;  %v1542_v7 = vld [vmem:[%s1410_s5 + $0x160] sm:$0xff]  ;;  %v1545_v8 = vld [vmem:[%s1410_s5 + $0x168] sm:$0xff]  ;;  %v1548_v9 = vld [vmem:[%s1410_s5 + $0x170] sm:$0xff] }
  0xbe   : > { %v481_v43 = vmul.f32 %v1435_v18, %v219_v10  ;;  %v482_v44 = vmul.f32 %v1435_v18, %v220_v11  ;;  %v483_v45 = vmul.f32 %v1435_v18, %v221_v12  ;;  %v484_v46 = vmul.f32 %v1435_v18, %v222_v13  ;;  %729 = vst [vmem:[%s1475_s20] sm:$0xff] %v473_v27  ;;  %v1551_v10 = vld [vmem:[%s1410_s5 + $0x178] sm:$0xff] }
  0xbf   : > { %730 = vst [vmem:[%s1475_s20 + $0x8] sm:$0xff] %v474_v28  ;;  %731 = vst [vmem:[%s1475_s20 + $0x10] sm:$0xff] %v475_v29  ;;  %v485_v51 = vmul.f32 %v1435_v18, %v223_v14  ;;  %v486_v52 = vmul.f32 %v1435_v18, %v224_v15  ;;  %v487_v53 = vmul.f32 %v1435_v18, %v225_v16  ;;  %v1562_v15 = vld [vmem:[%s1410_s5 + $0x180] sm:$0xff]  ;;  %v1565_v16 = vld [vmem:[%s1410_s5 + $0x188] sm:$0xff] }
  0xc0   : > { %732 = vst [vmem:[%s1475_s20 + $0x18] sm:$0xff] %v476_v30  ;;  %v488_v54 = vmul.f32 %v1435_v18, %v226_v17  ;;  %733 = vst [vmem:[%s1475_s20 + $0x20] sm:$0xff] %v477_v35  ;;  %v489_v59 = vmul.f32 %v1435_v18, %v227_v19  ;;  %v490_v60 = vmul.f32 %v1435_v18, %v228_v20  ;;  %v1568_v17 = vld [vmem:[%s1410_s5 + $0x190] sm:$0xff]  ;;  %v1571_v19 = vld [vmem:[%s1410_s5 + $0x198] sm:$0xff] }
  0xc1   : > { %734 = vst [vmem:[%s1475_s20 + $0x28] sm:$0xff] %v478_v36  ;;  %735 = vst [vmem:[%s1475_s20 + $0x30] sm:$0xff] %v479_v37  ;;  %v491_v61 = vmul.f32 %v1435_v18, %v229_v21  ;;  %v492_v62 = vmul.f32 %v1435_v18, %v230_v22  ;;  %v493_v3 = vmul.f32 %v1435_v18, %v231_v23  ;;  %v1595_v27 = vld [vmem:[%s1410_s5 + $0x1b8] sm:$0xff] }
  0xc2   : > { %736 = vst [vmem:[%s1475_s20 + $0x38] sm:$0xff] %v480_v38  ;;  %737 = vst [vmem:[%s1475_s20 + $0x40] sm:$0xff] %v481_v43  ;;  %v494_v4 = vmul.f32 %v1435_v18, %v232_v24  ;;  %v495_v5 = vmul.f32 %v1435_v18, %v233_v25  ;;  %v496_v6 = vmul.f32 %v1435_v18, %v234_v26  ;;  %v1586_v24 = vld [vmem:[%s1410_s5 + $0x1a0] sm:$0xff]  ;;  %v1589_v25 = vld [vmem:[%s1410_s5 + $0x1a8] sm:$0xff] }
  0xc3   : > { %738 = vst [vmem:[%s1475_s20 + $0x48] sm:$0xff] %v482_v44  ;;  %739 = vst [vmem:[%s1475_s20 + $0x50] sm:$0xff] %v483_v45  ;;  %v497_v11 = vmul.f32 %v1435_v18, %v235_v31  ;;  %v498_v12 = vmul.f32 %v1435_v18, %v236_v32  ;;  %v499_v13 = vmul.f32 %v1435_v18, %v237_v33  ;;  %v1592_v26 = vld [vmem:[%s1410_s5 + $0x1b0] sm:$0xff]  ;;  %v1610_v32 = vld [vmem:[%s1410_s5 + $0x1c0] sm:$0xff] }
  0xc4   : > { %740 = vst [vmem:[%s1475_s20 + $0x58] sm:$0xff] %v484_v46  ;;  %741 = vst [vmem:[%s1475_s20 + $0x60] sm:$0xff] %v485_v51  ;;  %v500_v14 = vmul.f32 %v1435_v18, %v238_v34  ;;  %v501_v20 = vmul.f32 %v1435_v18, %v1458_v39  ;;  %v502_v21 = vmul.f32 %v1435_v18, %v1461_v40  ;;  %v1613_v33 = vld [vmem:[%s1410_s5 + $0x1c8] sm:$0xff]  ;;  %v1616_v34 = vld [vmem:[%s1410_s5 + $0x1d0] sm:$0xff] }
  0xc5   : > { %742 = vst [vmem:[%s1475_s20 + $0x68] sm:$0xff] %v486_v52  ;;  %743 = vst [vmem:[%s1475_s20 + $0x70] sm:$0xff] %v487_v53  ;;  %v503_v22 = vmul.f32 %v1435_v18, %v1464_v41  ;;  %v504_v23 = vmul.f32 %v1435_v18, %v1467_v42  ;;  %v505_v28 = vmul.f32 %v1435_v18, %v1482_v47  ;;  %v1619_v35 = vld [vmem:[%s1410_s5 + $0x1d8] sm:$0xff]  ;;  %v1634_v40 = vld [vmem:[%s1410_s5 + $0x1e0] sm:$0xff] }
  0xc6   : > { %744 = vst [vmem:[%s1475_s20 + $0x78] sm:$0xff] %v488_v54  ;;  %745 = vst [vmem:[%s1475_s20 + $0x80] sm:$0xff] %v489_v59  ;;  %v506_v29 = vmul.f32 %v1435_v18, %v1485_v48  ;;  %v507_v30 = vmul.f32 %v1435_v18, %v1488_v49  ;;  %v508_v31 = vmul.f32 %v1435_v18, %v1491_v50  ;;  %v1637_v41 = vld [vmem:[%s1410_s5 + $0x1e8] sm:$0xff]  ;;  %v1640_v42 = vld [vmem:[%s1410_s5 + $0x1f0] sm:$0xff] }
  0xc7   : > { %746 = vst [vmem:[%s1475_s20 + $0x88] sm:$0xff] %v490_v60  ;;  %747 = vst [vmem:[%s1475_s20 + $0x90] sm:$0xff] %v491_v61  ;;  %v509_v36 = vmul.f32 %v1435_v18, %v1502_v55  ;;  %v510_v37 = vmul.f32 %v1435_v18, %v1505_v56  ;;  %v511_v38 = vmul.f32 %v1435_v18, %v1508_v57  ;;  %v1643_v43 = vld [vmem:[%s1410_s5 + $0x1f8] sm:$0xff]  ;;  %v1658_v48 = vld [vmem:[%s1410_s5 + $0x200] sm:$0xff] }
  0xc8   : > { %748 = vst [vmem:[%s1475_s20 + $0x98] sm:$0xff] %v492_v62  ;;  %749 = vst [vmem:[%s1475_s20 + $0xa0] sm:$0xff] %v493_v3  ;;  %v512_v39 = vmul.f32 %v1435_v18, %v1511_v58  ;;  %v513_v44 = vmul.f32 %v1435_v18, %v1522_v63  ;;  %v514_v45 = vmul.f32 %v1435_v18, %v1525_v0  ;;  %v1661_v49 = vld [vmem:[%s1410_s5 + $0x208] sm:$0xff]  ;;  %v1664_v50 = vld [vmem:[%s1410_s5 + $0x210] sm:$0xff] }
  0xc9   : > { %750 = vst [vmem:[%s1475_s20 + $0xa8] sm:$0xff] %v494_v4  ;;  %751 = vst [vmem:[%s1475_s20 + $0xb0] sm:$0xff] %v495_v5  ;;  %v515_v46 = vmul.f32 %v1435_v18, %v1528_v1  ;;  %v516_v47 = vmul.f32 %v1435_v18, %v1531_v2  ;;  %v1667_v51 = vld [vmem:[%s1410_s5 + $0x218] sm:$0xff]  ;;  %v517_v52 = vmul.f32 %v1435_v18, %v1542_v7  ;;  %v1682_v56 = vld [vmem:[%s1410_s5 + $0x220] sm:$0xff] }
  0xca   : > { %752 = vst [vmem:[%s1475_s20 + $0xb8] sm:$0xff] %v496_v6  ;;  %753 = vst [vmem:[%s1475_s20 + $0xc0] sm:$0xff] %v497_v11  ;;  %v518_v53 = vmul.f32 %v1435_v18, %v1545_v8  ;;  %v519_v54 = vmul.f32 %v1435_v18, %v1548_v9  ;;  %v520_v55 = vmul.f32 %v1435_v18, %v1551_v10  ;;  %v1685_v57 = vld [vmem:[%s1410_s5 + $0x228] sm:$0xff]  ;;  %v1688_v58 = vld [vmem:[%s1410_s5 + $0x230] sm:$0xff] }
  0xcb   : > { %754 = vst [vmem:[%s1475_s20 + $0xc8] sm:$0xff] %v498_v12  ;;  %755 = vst [vmem:[%s1475_s20 + $0xd0] sm:$0xff] %v499_v13  ;;  %v1691_v59 = vld [vmem:[%s1410_s5 + $0x238] sm:$0xff]  ;;  %v521_v60 = vmul.f32 %v1435_v18, %v1562_v15  ;;  %v522_v61 = vmul.f32 %v1435_v18, %v1565_v16  ;;  %v523_v62 = vmul.f32 %v1435_v18, %v1568_v17  ;;  %v1706_v0 = vld [vmem:[%s1410_s5 + $0x240] sm:$0xff] }
  0xcc   : > { %756 = vst [vmem:[%s1475_s20 + $0xd8] sm:$0xff] %v500_v14  ;;  %757 = vst [vmem:[%s1475_s20 + $0xe0] sm:$0xff] %v501_v20  ;;  %v524_v63 = vmul.f32 %v1435_v18, %v1571_v19  ;;  %v1709_v1 = vld [vmem:[%s1410_s5 + $0x248] sm:$0xff]  ;;  %v1712_v2 = vld [vmem:[%s1410_s5 + $0x250] sm:$0xff]  ;;  %v525_v4 = vmul.f32 %v1435_v18, %v1586_v24  ;;  %v526_v5 = vmul.f32 %v1435_v18, %v1589_v25 }
  0xcd   : > { %758 = vst [vmem:[%s1475_s20 + $0xe8] sm:$0xff] %v502_v21  ;;  %759 = vst [vmem:[%s1475_s20 + $0xf0] sm:$0xff] %v503_v22  ;;  %v1715_v3 = vld [vmem:[%s1410_s5 + $0x258] sm:$0xff]  ;;  %v527_v6 = vmul.f32 %v1435_v18, %v1592_v26  ;;  %v528_v7 = vmul.f32 %v1435_v18, %v1595_v27  ;;  %v1730_v8 = vld [vmem:[%s1410_s5 + $0x260] sm:$0xff]  ;;  %v529_v12 = vmul.f32 %v1435_v18, %v1610_v32 }
  0xce   : > { %760 = vst [vmem:[%s1475_s20 + $0xf8] sm:$0xff] %v504_v23  ;;  %761 = vst [vmem:[%s1475_s20 + $0x100] sm:$0xff] %v505_v28  ;;  %v1733_v9 = vld [vmem:[%s1410_s5 + $0x268] sm:$0xff]  ;;  %v1736_v10 = vld [vmem:[%s1410_s5 + $0x270] sm:$0xff]  ;;  %v530_v13 = vmul.f32 %v1435_v18, %v1613_v33  ;;  %v531_v14 = vmul.f32 %v1435_v18, %v1616_v34  ;;  %v532_v15 = vmul.f32 %v1435_v18, %v1619_v35 }
  0xcf   : > { %762 = vst [vmem:[%s1475_s20 + $0x108] sm:$0xff] %v506_v29  ;;  %763 = vst [vmem:[%s1475_s20 + $0x110] sm:$0xff] %v507_v30  ;;  %v1739_v11 = vld [vmem:[%s1410_s5 + $0x278] sm:$0xff]  ;;  %v1754_v16 = vld [vmem:[%s1410_s5 + $0x280] sm:$0xff]  ;;  %v533_v21 = vmul.f32 %v1435_v18, %v1634_v40  ;;  %v534_v22 = vmul.f32 %v1435_v18, %v1637_v41  ;;  %v535_v23 = vmul.f32 %v1435_v18, %v1640_v42 }
  0xd0   : > { %764 = vst [vmem:[%s1475_s20 + $0x118] sm:$0xff] %v508_v31  ;;  %765 = vst [vmem:[%s1475_s20 + $0x120] sm:$0xff] %v509_v36  ;;  %v1757_v17 = vld [vmem:[%s1410_s5 + $0x288] sm:$0xff]  ;;  %v1760_v19 = vld [vmem:[%s1410_s5 + $0x290] sm:$0xff]  ;;  %v536_v24 = vmul.f32 %v1435_v18, %v1643_v43  ;;  %v537_v29 = vmul.f32 %v1435_v18, %v1658_v48  ;;  %v538_v30 = vmul.f32 %v1435_v18, %v1661_v49 }
  0xd1   : > { %766 = vst [vmem:[%s1475_s20 + $0x128] sm:$0xff] %v510_v37  ;;  %767 = vst [vmem:[%s1475_s20 + $0x130] sm:$0xff] %v511_v38  ;;  %v1763_v20 = vld [vmem:[%s1410_s5 + $0x298] sm:$0xff]  ;;  %v1778_v25 = vld [vmem:[%s1410_s5 + $0x2a0] sm:$0xff]  ;;  %v539_v31 = vmul.f32 %v1435_v18, %v1664_v50  ;;  %v540_v32 = vmul.f32 %v1435_v18, %v1667_v51  ;;  %v541_v37 = vmul.f32 %v1435_v18, %v1682_v56 }
  0xd2   : > { %768 = vst [vmem:[%s1475_s20 + $0x138] sm:$0xff] %v512_v39  ;;  %769 = vst [vmem:[%s1475_s20 + $0x140] sm:$0xff] %v513_v44  ;;  %v1781_v26 = vld [vmem:[%s1410_s5 + $0x2a8] sm:$0xff]  ;;  %v1784_v27 = vld [vmem:[%s1410_s5 + $0x2b0] sm:$0xff]  ;;  %v542_v38 = vmul.f32 %v1435_v18, %v1685_v57  ;;  %v543_v39 = vmul.f32 %v1435_v18, %v1688_v58  ;;  %v544_v40 = vmul.f32 %v1435_v18, %v1691_v59 }
  0xd3   : > { %770 = vst [vmem:[%s1475_s20 + $0x148] sm:$0xff] %v514_v45  ;;  %771 = vst [vmem:[%s1475_s20 + $0x150] sm:$0xff] %v515_v46  ;;  %v1787_v28 = vld [vmem:[%s1410_s5 + $0x2b8] sm:$0xff]  ;;  %v1802_v33 = vld [vmem:[%s1410_s5 + $0x2c0] sm:$0xff]  ;;  %v545_v45 = vmul.f32 %v1435_v18, %v1706_v0  ;;  %v546_v46 = vmul.f32 %v1435_v18, %v1709_v1  ;;  %v548_v48 = vmul.f32 %v1435_v18, %v1715_v3 }
  0xd4   : > { %772 = vst [vmem:[%s1475_s20 + $0x158] sm:$0xff] %v516_v47  ;;  %773 = vst [vmem:[%s1475_s20 + $0x160] sm:$0xff] %v517_v52  ;;  %v1805_v34 = vld [vmem:[%s1410_s5 + $0x2c8] sm:$0xff]  ;;  %v1808_v35 = vld [vmem:[%s1410_s5 + $0x2d0] sm:$0xff]  ;;  %v547_v47 = vmul.f32 %v1435_v18, %v1712_v2  ;;  %v552_v56 = vmul.f32 %v1435_v18, %v1739_v11  ;;  %v556_v0 = vmul.f32 %v1435_v18, %v1763_v20 }
  0xd5   : > { %774 = vst [vmem:[%s1475_s20 + $0x168] sm:$0xff] %v518_v53  ;;  %775 = vst [vmem:[%s1475_s20 + $0x170] sm:$0xff] %v519_v54  ;;  %v1811_v36 = vld [vmem:[%s1410_s5 + $0x2d8] sm:$0xff]  ;;  %v1826_v41 = vld [vmem:[%s1410_s5 + $0x2e0] sm:$0xff]  ;;  %v549_v53 = vmul.f32 %v1435_v18, %v1730_v8  ;;  %v550_v54 = vmul.f32 %v1435_v18, %v1733_v9  ;;  %v560_v8 = vmul.f32 %v1435_v18, %v1787_v28 }
  0xd6   : > { %776 = vst [vmem:[%s1475_s20 + $0x178] sm:$0xff] %v520_v55  ;;  %777 = vst [vmem:[%s1475_s20 + $0x180] sm:$0xff] %v521_v60  ;;  %v1829_v42 = vld [vmem:[%s1410_s5 + $0x2e8] sm:$0xff]  ;;  %v1832_v43 = vld [vmem:[%s1410_s5 + $0x2f0] sm:$0xff]  ;;  %v551_v55 = vmul.f32 %v1435_v18, %v1736_v10 }
  0xd7   : > { %778 = vst [vmem:[%s1475_s20 + $0x188] sm:$0xff] %v522_v61  ;;  %779 = vst [vmem:[%s1475_s20 + $0x190] sm:$0xff] %v523_v62  ;;  %v1835_v44 = vld [vmem:[%s1410_s5 + $0x2f8] sm:$0xff]  ;;  %v1850_v49 = vld [vmem:[%s1410_s5 + $0x300] sm:$0xff]  ;;  %v553_v61 = vmul.f32 %v1435_v18, %v1754_v16  ;;  %v554_v62 = vmul.f32 %v1435_v18, %v1757_v17  ;;  %v564_v16 = vmul.f32 %v1435_v18, %v1811_v36 }
  0xd8   : > { %780 = vst [vmem:[%s1475_s20 + $0x198] sm:$0xff] %v524_v63  ;;  %781 = vst [vmem:[%s1475_s20 + $0x1a0] sm:$0xff] %v525_v4  ;;  %v1853_v50 = vld [vmem:[%s1410_s5 + $0x308] sm:$0xff]  ;;  %v1856_v51 = vld [vmem:[%s1410_s5 + $0x310] sm:$0xff]  ;;  %v555_v63 = vmul.f32 %v1435_v18, %v1760_v19 }
  0xd9   : > { %782 = vst [vmem:[%s1475_s20 + $0x1a8] sm:$0xff] %v526_v5  ;;  %783 = vst [vmem:[%s1475_s20 + $0x1b0] sm:$0xff] %v527_v6  ;;  %v1859_v52 = vld [vmem:[%s1410_s5 + $0x318] sm:$0xff]  ;;  %v1874_v57 = vld [vmem:[%s1410_s5 + $0x320] sm:$0xff]  ;;  %v557_v5 = vmul.f32 %v1435_v18, %v1778_v25  ;;  %v558_v6 = vmul.f32 %v1435_v18, %v1781_v26  ;;  %v568_v25 = vmul.f32 %v1435_v18, %v1835_v44 }
  0xda   : > { %784 = vst [vmem:[%s1475_s20 + $0x1b8] sm:$0xff] %v528_v7  ;;  %785 = vst [vmem:[%s1475_s20 + $0x1c0] sm:$0xff] %v529_v12  ;;  %v1877_v58 = vld [vmem:[%s1410_s5 + $0x328] sm:$0xff]  ;;  %v1880_v59 = vld [vmem:[%s1410_s5 + $0x330] sm:$0xff]  ;;  %v559_v7 = vmul.f32 %v1435_v18, %v1784_v27 }
  0xdb   : > { %786 = vst [vmem:[%s1475_s20 + $0x1c8] sm:$0xff] %v530_v13  ;;  %787 = vst [vmem:[%s1475_s20 + $0x1d0] sm:$0xff] %v531_v14  ;;  %v1883_v60 = vld [vmem:[%s1410_s5 + $0x338] sm:$0xff]  ;;  %v1898_v1 = vld [vmem:[%s1410_s5 + $0x340] sm:$0xff]  ;;  %v561_v13 = vmul.f32 %v1435_v18, %v1802_v33  ;;  %v562_v14 = vmul.f32 %v1435_v18, %v1805_v34  ;;  %v572_v33 = vmul.f32 %v1435_v18, %v1859_v52 }
  0xdc   : > { %788 = vst [vmem:[%s1475_s20 + $0x1d8] sm:$0xff] %v532_v15  ;;  %789 = vst [vmem:[%s1475_s20 + $0x1e0] sm:$0xff] %v533_v21  ;;  %v1901_v2 = vld [vmem:[%s1410_s5 + $0x348] sm:$0xff]  ;;  %v1904_v3 = vld [vmem:[%s1410_s5 + $0x350] sm:$0xff]  ;;  %v563_v15 = vmul.f32 %v1435_v18, %v1808_v35 }
  0xdd   : > { %790 = vst [vmem:[%s1475_s20 + $0x1e8] sm:$0xff] %v534_v22  ;;  %791 = vst [vmem:[%s1475_s20 + $0x1f0] sm:$0xff] %v535_v23  ;;  %v1907_v4 = vld [vmem:[%s1410_s5 + $0x358] sm:$0xff]  ;;  %v1922_v9 = vld [vmem:[%s1410_s5 + $0x360] sm:$0xff]  ;;  %v565_v22 = vmul.f32 %v1435_v18, %v1826_v41  ;;  %v566_v23 = vmul.f32 %v1435_v18, %v1829_v42  ;;  %v576_v41 = vmul.f32 %v1435_v18, %v1883_v60 }
  0xde   : > { %792 = vst [vmem:[%s1475_s20 + $0x1f8] sm:$0xff] %v536_v24  ;;  %793 = vst [vmem:[%s1475_s20 + $0x200] sm:$0xff] %v537_v29  ;;  %v1925_v10 = vld [vmem:[%s1410_s5 + $0x368] sm:$0xff]  ;;  %v1928_v11 = vld [vmem:[%s1410_s5 + $0x370] sm:$0xff]  ;;  %v567_v24 = vmul.f32 %v1435_v18, %v1832_v43 }
  0xdf   : > { %794 = vst [vmem:[%s1475_s20 + $0x208] sm:$0xff] %v538_v30  ;;  %795 = vst [vmem:[%s1475_s20 + $0x210] sm:$0xff] %v539_v31  ;;  %v1931_v12 = vld [vmem:[%s1410_s5 + $0x378] sm:$0xff]  ;;  %v1946_v17 = vld [vmem:[%s1410_s5 + $0x380] sm:$0xff]  ;;  %v569_v30 = vmul.f32 %v1435_v18, %v1850_v49  ;;  %v570_v31 = vmul.f32 %v1435_v18, %v1853_v50  ;;  %v580_v49 = vmul.f32 %v1435_v18, %v1907_v4 }
  0xe0   : > { %796 = vst [vmem:[%s1475_s20 + $0x218] sm:$0xff] %v540_v32  ;;  %797 = vst [vmem:[%s1475_s20 + $0x220] sm:$0xff] %v541_v37  ;;  %v1949_v19 = vld [vmem:[%s1410_s5 + $0x388] sm:$0xff]  ;;  %v1952_v20 = vld [vmem:[%s1410_s5 + $0x390] sm:$0xff]  ;;  %v571_v32 = vmul.f32 %v1435_v18, %v1856_v51 }
  0xe1   : > { %798 = vst [vmem:[%s1475_s20 + $0x228] sm:$0xff] %v542_v38  ;;  %799 = vst [vmem:[%s1475_s20 + $0x230] sm:$0xff] %v543_v39  ;;  %v1955_v21 = vld [vmem:[%s1410_s5 + $0x398] sm:$0xff]  ;;  %v1970_v26 = vld [vmem:[%s1410_s5 + $0x3a0] sm:$0xff]  ;;  %v573_v38 = vmul.f32 %v1435_v18, %v1874_v57  ;;  %v574_v39 = vmul.f32 %v1435_v18, %v1877_v58  ;;  %v584_v57 = vmul.f32 %v1435_v18, %v1931_v12 }
  0xe2   : > { %800 = vst [vmem:[%s1475_s20 + $0x238] sm:$0xff] %v544_v40  ;;  %801 = vst [vmem:[%s1475_s20 + $0x240] sm:$0xff] %v545_v45  ;;  %v1973_v27 = vld [vmem:[%s1410_s5 + $0x3a8] sm:$0xff]  ;;  %v1976_v28 = vld [vmem:[%s1410_s5 + $0x3b0] sm:$0xff]  ;;  %v575_v40 = vmul.f32 %v1435_v18, %v1880_v59 }
  0xe3   : > { %802 = vst [vmem:[%s1475_s20 + $0x248] sm:$0xff] %v546_v46  ;;  %803 = vst [vmem:[%s1475_s20 + $0x250] sm:$0xff] %v547_v47  ;;  %v1979_v29 = vld [vmem:[%s1410_s5 + $0x3b8] sm:$0xff]  ;;  %v1994_v34 = vld [vmem:[%s1410_s5 + $0x3c0] sm:$0xff]  ;;  %v577_v46 = vmul.f32 %v1435_v18, %v1898_v1  ;;  %v578_v47 = vmul.f32 %v1435_v18, %v1901_v2  ;;  %v588_v1 = vmul.f32 %v1435_v18, %v1955_v21 }
  0xe4   : > { %804 = vst [vmem:[%s1475_s20 + $0x258] sm:$0xff] %v548_v48  ;;  %805 = vst [vmem:[%s1475_s20 + $0x260] sm:$0xff] %v549_v53  ;;  %v1997_v35 = vld [vmem:[%s1410_s5 + $0x3c8] sm:$0xff]  ;;  %v2000_v36 = vld [vmem:[%s1410_s5 + $0x3d0] sm:$0xff]  ;;  %v579_v48 = vmul.f32 %v1435_v18, %v1904_v3 }
  0xe5   : > { %806 = vst [vmem:[%s1475_s20 + $0x268] sm:$0xff] %v550_v54  ;;  %807 = vst [vmem:[%s1475_s20 + $0x270] sm:$0xff] %v551_v55  ;;  %v2003_v37 = vld [vmem:[%s1410_s5 + $0x3d8] sm:$0xff]  ;;  %v2018_v42 = vld [vmem:[%s1410_s5 + $0x3e0] sm:$0xff]  ;;  %v581_v54 = vmul.f32 %v1435_v18, %v1922_v9  ;;  %v582_v55 = vmul.f32 %v1435_v18, %v1925_v10  ;;  %v592_v9 = vmul.f32 %v1435_v18, %v1979_v29 }
  0xe6   : > { %808 = vst [vmem:[%s1475_s20 + $0x278] sm:$0xff] %v552_v56  ;;  %809 = vst [vmem:[%s1475_s20 + $0x280] sm:$0xff] %v553_v61  ;;  %v2021_v43 = vld [vmem:[%s1410_s5 + $0x3e8] sm:$0xff]  ;;  %v2024_v44 = vld [vmem:[%s1410_s5 + $0x3f0] sm:$0xff]  ;;  %v583_v56 = vmul.f32 %v1435_v18, %v1928_v11 }
  0xe7   : > { %810 = vst [vmem:[%s1475_s20 + $0x288] sm:$0xff] %v554_v62  ;;  %811 = vst [vmem:[%s1475_s20 + $0x290] sm:$0xff] %v555_v63  ;;  %v2027_v45 = vld [vmem:[%s1410_s5 + $0x3f8] sm:$0xff]  ;;  %v2042_v50 = vld [vmem:[%s1410_s5 + $0x400] sm:$0xff]  ;;  %v585_v62 = vmul.f32 %v1435_v18, %v1946_v17  ;;  %v586_v63 = vmul.f32 %v1435_v18, %v1949_v19  ;;  %v596_v17 = vmul.f32 %v1435_v18, %v2003_v37 }
  0xe8   : > { %812 = vst [vmem:[%s1475_s20 + $0x298] sm:$0xff] %v556_v0  ;;  %813 = vst [vmem:[%s1475_s20 + $0x2a0] sm:$0xff] %v557_v5  ;;  %v2045_v51 = vld [vmem:[%s1410_s5 + $0x408] sm:$0xff]  ;;  %v2048_v52 = vld [vmem:[%s1410_s5 + $0x410] sm:$0xff]  ;;  %v587_v0 = vmul.f32 %v1435_v18, %v1952_v20 }
  0xe9   : > { %814 = vst [vmem:[%s1475_s20 + $0x2a8] sm:$0xff] %v558_v6  ;;  %815 = vst [vmem:[%s1475_s20 + $0x2b0] sm:$0xff] %v559_v7  ;;  %v2051_v53 = vld [vmem:[%s1410_s5 + $0x418] sm:$0xff]  ;;  %v2066_v58 = vld [vmem:[%s1410_s5 + $0x420] sm:$0xff]  ;;  %v589_v6 = vmul.f32 %v1435_v18, %v1970_v26  ;;  %v590_v7 = vmul.f32 %v1435_v18, %v1973_v27  ;;  %v600_v26 = vmul.f32 %v1435_v18, %v2027_v45 }
  0xea   : > { %816 = vst [vmem:[%s1475_s20 + $0x2b8] sm:$0xff] %v560_v8  ;;  %817 = vst [vmem:[%s1475_s20 + $0x2c0] sm:$0xff] %v561_v13  ;;  %v2069_v59 = vld [vmem:[%s1410_s5 + $0x428] sm:$0xff]  ;;  %v2072_v60 = vld [vmem:[%s1410_s5 + $0x430] sm:$0xff]  ;;  %v591_v8 = vmul.f32 %v1435_v18, %v1976_v28 }
  0xeb   : > { %818 = vst [vmem:[%s1475_s20 + $0x2c8] sm:$0xff] %v562_v14  ;;  %819 = vst [vmem:[%s1475_s20 + $0x2d0] sm:$0xff] %v563_v15  ;;  %v2075_v61 = vld [vmem:[%s1410_s5 + $0x438] sm:$0xff]  ;;  %v2090_v2 = vld [vmem:[%s1410_s5 + $0x440] sm:$0xff]  ;;  %v593_v14 = vmul.f32 %v1435_v18, %v1994_v34  ;;  %v594_v15 = vmul.f32 %v1435_v18, %v1997_v35  ;;  %v604_v34 = vmul.f32 %v1435_v18, %v2051_v53 }
  0xec   : > { %820 = vst [vmem:[%s1475_s20 + $0x2d8] sm:$0xff] %v564_v16  ;;  %821 = vst [vmem:[%s1475_s20 + $0x2e0] sm:$0xff] %v565_v22  ;;  %v2093_v3 = vld [vmem:[%s1410_s5 + $0x448] sm:$0xff]  ;;  %v2096_v4 = vld [vmem:[%s1410_s5 + $0x450] sm:$0xff]  ;;  %v595_v16 = vmul.f32 %v1435_v18, %v2000_v36 }
  0xed   : > { %822 = vst [vmem:[%s1475_s20 + $0x2e8] sm:$0xff] %v566_v23  ;;  %823 = vst [vmem:[%s1475_s20 + $0x2f0] sm:$0xff] %v567_v24  ;;  %v2099_v5 = vld [vmem:[%s1410_s5 + $0x458] sm:$0xff]  ;;  %v2114_v10 = vld [vmem:[%s1410_s5 + $0x460] sm:$0xff]  ;;  %v597_v23 = vmul.f32 %v1435_v18, %v2018_v42  ;;  %v598_v24 = vmul.f32 %v1435_v18, %v2021_v43  ;;  %v608_v42 = vmul.f32 %v1435_v18, %v2075_v61 }
  0xee   : > { %824 = vst [vmem:[%s1475_s20 + $0x2f8] sm:$0xff] %v568_v25  ;;  %825 = vst [vmem:[%s1475_s20 + $0x300] sm:$0xff] %v569_v30  ;;  %v2117_v11 = vld [vmem:[%s1410_s5 + $0x468] sm:$0xff]  ;;  %v2120_v12 = vld [vmem:[%s1410_s5 + $0x470] sm:$0xff]  ;;  %v599_v25 = vmul.f32 %v1435_v18, %v2024_v44 }
  0xef   : > { %826 = vst [vmem:[%s1475_s20 + $0x308] sm:$0xff] %v570_v31  ;;  %827 = vst [vmem:[%s1475_s20 + $0x310] sm:$0xff] %v571_v32  ;;  %v2123_v13 = vld [vmem:[%s1410_s5 + $0x478] sm:$0xff]  ;;  %v2138_v19 = vld [vmem:[%s1410_s5 + $0x480] sm:$0xff]  ;;  %v601_v31 = vmul.f32 %v1435_v18, %v2042_v50  ;;  %v602_v32 = vmul.f32 %v1435_v18, %v2045_v51  ;;  %v612_v50 = vmul.f32 %v1435_v18, %v2099_v5 }
  0xf0   : > { %828 = vst [vmem:[%s1475_s20 + $0x318] sm:$0xff] %v572_v33  ;;  %829 = vst [vmem:[%s1475_s20 + $0x320] sm:$0xff] %v573_v38  ;;  %v2141_v20 = vld [vmem:[%s1410_s5 + $0x488] sm:$0xff]  ;;  %v2144_v21 = vld [vmem:[%s1410_s5 + $0x490] sm:$0xff]  ;;  %v603_v33 = vmul.f32 %v1435_v18, %v2048_v52 }
  0xf1   : > { %830 = vst [vmem:[%s1475_s20 + $0x328] sm:$0xff] %v574_v39  ;;  %831 = vst [vmem:[%s1475_s20 + $0x330] sm:$0xff] %v575_v40  ;;  %v2147_v22 = vld [vmem:[%s1410_s5 + $0x498] sm:$0xff]  ;;  %v2162_v27 = vld [vmem:[%s1410_s5 + $0x4a0] sm:$0xff]  ;;  %v605_v39 = vmul.f32 %v1435_v18, %v2066_v58  ;;  %v606_v40 = vmul.f32 %v1435_v18, %v2069_v59  ;;  %v616_v58 = vmul.f32 %v1435_v18, %v2123_v13 }
  0xf2   : > { %832 = vst [vmem:[%s1475_s20 + $0x338] sm:$0xff] %v576_v41  ;;  %833 = vst [vmem:[%s1475_s20 + $0x340] sm:$0xff] %v577_v46  ;;  %v2165_v28 = vld [vmem:[%s1410_s5 + $0x4a8] sm:$0xff]  ;;  %v2168_v29 = vld [vmem:[%s1410_s5 + $0x4b0] sm:$0xff]  ;;  %v607_v41 = vmul.f32 %v1435_v18, %v2072_v60 }
  0xf3   : > { %834 = vst [vmem:[%s1475_s20 + $0x348] sm:$0xff] %v578_v47  ;;  %835 = vst [vmem:[%s1475_s20 + $0x350] sm:$0xff] %v579_v48  ;;  %v2171_v30 = vld [vmem:[%s1410_s5 + $0x4b8] sm:$0xff]  ;;  %v2186_v35 = vld [vmem:[%s1410_s5 + $0x4c0] sm:$0xff]  ;;  %v609_v47 = vmul.f32 %v1435_v18, %v2090_v2  ;;  %v610_v48 = vmul.f32 %v1435_v18, %v2093_v3  ;;  %v620_v2 = vmul.f32 %v1435_v18, %v2147_v22 }
  0xf4   : > { %836 = vst [vmem:[%s1475_s20 + $0x358] sm:$0xff] %v580_v49  ;;  %837 = vst [vmem:[%s1475_s20 + $0x360] sm:$0xff] %v581_v54  ;;  %v2189_v36 = vld [vmem:[%s1410_s5 + $0x4c8] sm:$0xff]  ;;  %v2192_v37 = vld [vmem:[%s1410_s5 + $0x4d0] sm:$0xff]  ;;  %v611_v49 = vmul.f32 %v1435_v18, %v2096_v4 }
  0xf5   : > { %838 = vst [vmem:[%s1475_s20 + $0x368] sm:$0xff] %v582_v55  ;;  %839 = vst [vmem:[%s1475_s20 + $0x370] sm:$0xff] %v583_v56  ;;  %v2195_v38 = vld [vmem:[%s1410_s5 + $0x4d8] sm:$0xff]  ;;  %v2210_v43 = vld [vmem:[%s1410_s5 + $0x4e0] sm:$0xff]  ;;  %v613_v55 = vmul.f32 %v1435_v18, %v2114_v10  ;;  %v614_v56 = vmul.f32 %v1435_v18, %v2117_v11  ;;  %v624_v10 = vmul.f32 %v1435_v18, %v2171_v30 }
  0xf6   : > { %840 = vst [vmem:[%s1475_s20 + $0x378] sm:$0xff] %v584_v57  ;;  %841 = vst [vmem:[%s1475_s20 + $0x380] sm:$0xff] %v585_v62  ;;  %v2213_v44 = vld [vmem:[%s1410_s5 + $0x4e8] sm:$0xff]  ;;  %v2216_v45 = vld [vmem:[%s1410_s5 + $0x4f0] sm:$0xff]  ;;  %v615_v57 = vmul.f32 %v1435_v18, %v2120_v12 }
  0xf7   : > { %842 = vst [vmem:[%s1475_s20 + $0x388] sm:$0xff] %v586_v63  ;;  %843 = vst [vmem:[%s1475_s20 + $0x390] sm:$0xff] %v587_v0  ;;  %v2219_v46 = vld [vmem:[%s1410_s5 + $0x4f8] sm:$0xff]  ;;  %v2234_v51 = vld [vmem:[%s1410_s5 + $0x500] sm:$0xff]  ;;  %v617_v63 = vmul.f32 %v1435_v18, %v2138_v19  ;;  %v618_v0 = vmul.f32 %v1435_v18, %v2141_v20  ;;  %v628_v19 = vmul.f32 %v1435_v18, %v2195_v38 }
  0xf8   : > { %844 = vst [vmem:[%s1475_s20 + $0x398] sm:$0xff] %v588_v1  ;;  %845 = vst [vmem:[%s1475_s20 + $0x3a0] sm:$0xff] %v589_v6  ;;  %v2237_v52 = vld [vmem:[%s1410_s5 + $0x508] sm:$0xff]  ;;  %v2240_v53 = vld [vmem:[%s1410_s5 + $0x510] sm:$0xff]  ;;  %v619_v1 = vmul.f32 %v1435_v18, %v2144_v21 }
  0xf9   : > { %846 = vst [vmem:[%s1475_s20 + $0x3a8] sm:$0xff] %v590_v7  ;;  %847 = vst [vmem:[%s1475_s20 + $0x3b0] sm:$0xff] %v591_v8  ;;  %v2243_v54 = vld [vmem:[%s1410_s5 + $0x518] sm:$0xff]  ;;  %v2258_v59 = vld [vmem:[%s1410_s5 + $0x520] sm:$0xff]  ;;  %v621_v7 = vmul.f32 %v1435_v18, %v2162_v27  ;;  %v622_v8 = vmul.f32 %v1435_v18, %v2165_v28  ;;  %v632_v27 = vmul.f32 %v1435_v18, %v2219_v46 }
  0xfa   : > { %848 = vst [vmem:[%s1475_s20 + $0x3b8] sm:$0xff] %v592_v9  ;;  %849 = vst [vmem:[%s1475_s20 + $0x3c0] sm:$0xff] %v593_v14  ;;  %v2261_v60 = vld [vmem:[%s1410_s5 + $0x528] sm:$0xff]  ;;  %v2264_v61 = vld [vmem:[%s1410_s5 + $0x530] sm:$0xff]  ;;  %v623_v9 = vmul.f32 %v1435_v18, %v2168_v29 }
  0xfb   : > { %850 = vst [vmem:[%s1475_s20 + $0x3c8] sm:$0xff] %v594_v15  ;;  %851 = vst [vmem:[%s1475_s20 + $0x3d0] sm:$0xff] %v595_v16  ;;  %v2267_v62 = vld [vmem:[%s1410_s5 + $0x538] sm:$0xff]  ;;  %v2282_v3 = vld [vmem:[%s1410_s5 + $0x540] sm:$0xff]  ;;  %v625_v15 = vmul.f32 %v1435_v18, %v2186_v35  ;;  %v626_v16 = vmul.f32 %v1435_v18, %v2189_v36  ;;  %v636_v35 = vmul.f32 %v1435_v18, %v2243_v54 }
  0xfc   : > { %852 = vst [vmem:[%s1475_s20 + $0x3d8] sm:$0xff] %v596_v17  ;;  %853 = vst [vmem:[%s1475_s20 + $0x3e0] sm:$0xff] %v597_v23  ;;  %v2285_v4 = vld [vmem:[%s1410_s5 + $0x548] sm:$0xff]  ;;  %v2288_v5 = vld [vmem:[%s1410_s5 + $0x550] sm:$0xff]  ;;  %v627_v17 = vmul.f32 %v1435_v18, %v2192_v37 }
  0xfd   : > { %854 = vst [vmem:[%s1475_s20 + $0x3e8] sm:$0xff] %v598_v24  ;;  %855 = vst [vmem:[%s1475_s20 + $0x3f0] sm:$0xff] %v599_v25  ;;  %v2291_v6 = vld [vmem:[%s1410_s5 + $0x558] sm:$0xff]  ;;  %v2306_v11 = vld [vmem:[%s1410_s5 + $0x560] sm:$0xff]  ;;  %v629_v24 = vmul.f32 %v1435_v18, %v2210_v43  ;;  %v630_v25 = vmul.f32 %v1435_v18, %v2213_v44  ;;  %v640_v43 = vmul.f32 %v1435_v18, %v2267_v62 }
  0xfe   : > { %856 = vst [vmem:[%s1475_s20 + $0x3f8] sm:$0xff] %v600_v26  ;;  %857 = vst [vmem:[%s1475_s20 + $0x400] sm:$0xff] %v601_v31  ;;  %v2309_v12 = vld [vmem:[%s1410_s5 + $0x568] sm:$0xff]  ;;  %v2312_v13 = vld [vmem:[%s1410_s5 + $0x570] sm:$0xff]  ;;  %v631_v26 = vmul.f32 %v1435_v18, %v2216_v45 }
  0xff   : > { %858 = vst [vmem:[%s1475_s20 + $0x408] sm:$0xff] %v602_v32  ;;  %859 = vst [vmem:[%s1475_s20 + $0x410] sm:$0xff] %v603_v33  ;;  %v2315_v14 = vld [vmem:[%s1410_s5 + $0x578] sm:$0xff]  ;;  %v2330_v20 = vld [vmem:[%s1410_s5 + $0x580] sm:$0xff]  ;;  %v633_v32 = vmul.f32 %v1435_v18, %v2234_v51  ;;  %v634_v33 = vmul.f32 %v1435_v18, %v2237_v52  ;;  %v644_v51 = vmul.f32 %v1435_v18, %v2291_v6 }
 0x100   : > { %860 = vst [vmem:[%s1475_s20 + $0x418] sm:$0xff] %v604_v34  ;;  %861 = vst [vmem:[%s1475_s20 + $0x420] sm:$0xff] %v605_v39  ;;  %v2333_v21 = vld [vmem:[%s1410_s5 + $0x588] sm:$0xff]  ;;  %v2336_v22 = vld [vmem:[%s1410_s5 + $0x590] sm:$0xff]  ;;  %v635_v34 = vmul.f32 %v1435_v18, %v2240_v53 }
 0x101   : > { %862 = vst [vmem:[%s1475_s20 + $0x428] sm:$0xff] %v606_v40  ;;  %863 = vst [vmem:[%s1475_s20 + $0x430] sm:$0xff] %v607_v41  ;;  %v2339_v23 = vld [vmem:[%s1410_s5 + $0x598] sm:$0xff]  ;;  %v2354_v28 = vld [vmem:[%s1410_s5 + $0x5a0] sm:$0xff]  ;;  %v637_v40 = vmul.f32 %v1435_v18, %v2258_v59  ;;  %v638_v41 = vmul.f32 %v1435_v18, %v2261_v60  ;;  %v648_v59 = vmul.f32 %v1435_v18, %v2315_v14 }
 0x102   : > { %864 = vst [vmem:[%s1475_s20 + $0x438] sm:$0xff] %v608_v42  ;;  %865 = vst [vmem:[%s1475_s20 + $0x440] sm:$0xff] %v609_v47  ;;  %v2357_v29 = vld [vmem:[%s1410_s5 + $0x5a8] sm:$0xff]  ;;  %v2360_v30 = vld [vmem:[%s1410_s5 + $0x5b0] sm:$0xff]  ;;  %v639_v42 = vmul.f32 %v1435_v18, %v2264_v61 }
 0x103   : > { %866 = vst [vmem:[%s1475_s20 + $0x448] sm:$0xff] %v610_v48  ;;  %867 = vst [vmem:[%s1475_s20 + $0x450] sm:$0xff] %v611_v49  ;;  %v2363_v31 = vld [vmem:[%s1410_s5 + $0x5b8] sm:$0xff]  ;;  %v2378_v36 = vld [vmem:[%s1410_s5 + $0x5c0] sm:$0xff]  ;;  %v641_v48 = vmul.f32 %v1435_v18, %v2282_v3  ;;  %v642_v49 = vmul.f32 %v1435_v18, %v2285_v4  ;;  %v652_v3 = vmul.f32 %v1435_v18, %v2339_v23 }
 0x104   : > { %868 = vst [vmem:[%s1475_s20 + $0x458] sm:$0xff] %v612_v50  ;;  %869 = vst [vmem:[%s1475_s20 + $0x460] sm:$0xff] %v613_v55  ;;  %v2381_v37 = vld [vmem:[%s1410_s5 + $0x5c8] sm:$0xff]  ;;  %v2384_v38 = vld [vmem:[%s1410_s5 + $0x5d0] sm:$0xff]  ;;  %v643_v50 = vmul.f32 %v1435_v18, %v2288_v5 }
 0x105   : > { %870 = vst [vmem:[%s1475_s20 + $0x468] sm:$0xff] %v614_v56  ;;  %871 = vst [vmem:[%s1475_s20 + $0x470] sm:$0xff] %v615_v57  ;;  %v2387_v39 = vld [vmem:[%s1410_s5 + $0x5d8] sm:$0xff]  ;;  %v2402_v44 = vld [vmem:[%s1410_s5 + $0x5e0] sm:$0xff]  ;;  %v645_v56 = vmul.f32 %v1435_v18, %v2306_v11  ;;  %v646_v57 = vmul.f32 %v1435_v18, %v2309_v12  ;;  %v656_v11 = vmul.f32 %v1435_v18, %v2363_v31 }
 0x106   : > { %872 = vst [vmem:[%s1475_s20 + $0x478] sm:$0xff] %v616_v58  ;;  %873 = vst [vmem:[%s1475_s20 + $0x480] sm:$0xff] %v617_v63  ;;  %v2405_v45 = vld [vmem:[%s1410_s5 + $0x5e8] sm:$0xff]  ;;  %v2408_v46 = vld [vmem:[%s1410_s5 + $0x5f0] sm:$0xff]  ;;  %v647_v58 = vmul.f32 %v1435_v18, %v2312_v13 }
 0x107   : > { %874 = vst [vmem:[%s1475_s20 + $0x488] sm:$0xff] %v618_v0  ;;  %875 = vst [vmem:[%s1475_s20 + $0x490] sm:$0xff] %v619_v1  ;;  %v2411_v47 = vld [vmem:[%s1410_s5 + $0x5f8] sm:$0xff]  ;;  %v2426_v52 = vld [vmem:[%s1410_s5 + $0x600] sm:$0xff]  ;;  %v649_v0 = vmul.f32 %v1435_v18, %v2330_v20  ;;  %v650_v1 = vmul.f32 %v1435_v18, %v2333_v21  ;;  %v660_v20 = vmul.f32 %v1435_v18, %v2387_v39 }
 0x108   : > { %876 = vst [vmem:[%s1475_s20 + $0x498] sm:$0xff] %v620_v2  ;;  %877 = vst [vmem:[%s1475_s20 + $0x4a0] sm:$0xff] %v621_v7  ;;  %v2429_v53 = vld [vmem:[%s1410_s5 + $0x608] sm:$0xff]  ;;  %v2432_v54 = vld [vmem:[%s1410_s5 + $0x610] sm:$0xff]  ;;  %v651_v2 = vmul.f32 %v1435_v18, %v2336_v22 }
 0x109   : > { %878 = vst [vmem:[%s1475_s20 + $0x4a8] sm:$0xff] %v622_v8  ;;  %879 = vst [vmem:[%s1475_s20 + $0x4b0] sm:$0xff] %v623_v9  ;;  %v2435_v55 = vld [vmem:[%s1410_s5 + $0x618] sm:$0xff]  ;;  %v2450_v60 = vld [vmem:[%s1410_s5 + $0x620] sm:$0xff]  ;;  %v653_v8 = vmul.f32 %v1435_v18, %v2354_v28  ;;  %v654_v9 = vmul.f32 %v1435_v18, %v2357_v29  ;;  %v664_v28 = vmul.f32 %v1435_v18, %v2411_v47 }
 0x10a   : > { %880 = vst [vmem:[%s1475_s20 + $0x4b8] sm:$0xff] %v624_v10  ;;  %881 = vst [vmem:[%s1475_s20 + $0x4c0] sm:$0xff] %v625_v15  ;;  %v2453_v61 = vld [vmem:[%s1410_s5 + $0x628] sm:$0xff]  ;;  %v2456_v62 = vld [vmem:[%s1410_s5 + $0x630] sm:$0xff]  ;;  %v655_v10 = vmul.f32 %v1435_v18, %v2360_v30 }
 0x10b   : > { %882 = vst [vmem:[%s1475_s20 + $0x4c8] sm:$0xff] %v626_v16  ;;  %883 = vst [vmem:[%s1475_s20 + $0x4d0] sm:$0xff] %v627_v17  ;;  %v2459_v63 = vld [vmem:[%s1410_s5 + $0x638] sm:$0xff]  ;;  %v2474_v4 = vld [vmem:[%s1410_s5 + $0x640] sm:$0xff]  ;;  %v657_v16 = vmul.f32 %v1435_v18, %v2378_v36  ;;  %v658_v17 = vmul.f32 %v1435_v18, %v2381_v37  ;;  %v668_v36 = vmul.f32 %v1435_v18, %v2435_v55 }
 0x10c   : > { %884 = vst [vmem:[%s1475_s20 + $0x4d8] sm:$0xff] %v628_v19  ;;  %885 = vst [vmem:[%s1475_s20 + $0x4e0] sm:$0xff] %v629_v24  ;;  %v2477_v5 = vld [vmem:[%s1410_s5 + $0x648] sm:$0xff]  ;;  %v2480_v6 = vld [vmem:[%s1410_s5 + $0x650] sm:$0xff]  ;;  %v659_v19 = vmul.f32 %v1435_v18, %v2384_v38 }
 0x10d   : > { %886 = vst [vmem:[%s1475_s20 + $0x4e8] sm:$0xff] %v630_v25  ;;  %887 = vst [vmem:[%s1475_s20 + $0x4f0] sm:$0xff] %v631_v26  ;;  %v2483_v7 = vld [vmem:[%s1410_s5 + $0x658] sm:$0xff]  ;;  %v2498_v12 = vld [vmem:[%s1410_s5 + $0x660] sm:$0xff]  ;;  %v661_v25 = vmul.f32 %v1435_v18, %v2402_v44  ;;  %v662_v26 = vmul.f32 %v1435_v18, %v2405_v45  ;;  %v672_v44 = vmul.f32 %v1435_v18, %v2459_v63 }
 0x10e   : > { %888 = vst [vmem:[%s1475_s20 + $0x4f8] sm:$0xff] %v632_v27  ;;  %889 = vst [vmem:[%s1475_s20 + $0x500] sm:$0xff] %v633_v32  ;;  %v2501_v13 = vld [vmem:[%s1410_s5 + $0x668] sm:$0xff]  ;;  %v2504_v14 = vld [vmem:[%s1410_s5 + $0x670] sm:$0xff]  ;;  %v663_v27 = vmul.f32 %v1435_v18, %v2408_v46 }
 0x10f   : > { %890 = vst [vmem:[%s1475_s20 + $0x508] sm:$0xff] %v634_v33  ;;  %891 = vst [vmem:[%s1475_s20 + $0x510] sm:$0xff] %v635_v34  ;;  %v2507_v15 = vld [vmem:[%s1410_s5 + $0x678] sm:$0xff]  ;;  %v2522_v21 = vld [vmem:[%s1410_s5 + $0x680] sm:$0xff]  ;;  %v665_v33 = vmul.f32 %v1435_v18, %v2426_v52  ;;  %v666_v34 = vmul.f32 %v1435_v18, %v2429_v53  ;;  %v676_v52 = vmul.f32 %v1435_v18, %v2483_v7 }
 0x110   : > { %892 = vst [vmem:[%s1475_s20 + $0x518] sm:$0xff] %v636_v35  ;;  %893 = vst [vmem:[%s1475_s20 + $0x520] sm:$0xff] %v637_v40  ;;  %v2525_v22 = vld [vmem:[%s1410_s5 + $0x688] sm:$0xff]  ;;  %v2528_v23 = vld [vmem:[%s1410_s5 + $0x690] sm:$0xff]  ;;  %v667_v35 = vmul.f32 %v1435_v18, %v2432_v54 }
 0x111   : > { %894 = vst [vmem:[%s1475_s20 + $0x528] sm:$0xff] %v638_v41  ;;  %895 = vst [vmem:[%s1475_s20 + $0x530] sm:$0xff] %v639_v42  ;;  %v2531_v24 = vld [vmem:[%s1410_s5 + $0x698] sm:$0xff]  ;;  %v2546_v29 = vld [vmem:[%s1410_s5 + $0x6a0] sm:$0xff]  ;;  %v669_v41 = vmul.f32 %v1435_v18, %v2450_v60  ;;  %v670_v42 = vmul.f32 %v1435_v18, %v2453_v61  ;;  %v680_v60 = vmul.f32 %v1435_v18, %v2507_v15 }
 0x112   : > { %896 = vst [vmem:[%s1475_s20 + $0x538] sm:$0xff] %v640_v43  ;;  %897 = vst [vmem:[%s1475_s20 + $0x540] sm:$0xff] %v641_v48  ;;  %v2549_v30 = vld [vmem:[%s1410_s5 + $0x6a8] sm:$0xff]  ;;  %v2552_v31 = vld [vmem:[%s1410_s5 + $0x6b0] sm:$0xff]  ;;  %v671_v43 = vmul.f32 %v1435_v18, %v2456_v62 }
 0x113   : > { %898 = vst [vmem:[%s1475_s20 + $0x548] sm:$0xff] %v642_v49  ;;  %899 = vst [vmem:[%s1475_s20 + $0x550] sm:$0xff] %v643_v50  ;;  %v2555_v32 = vld [vmem:[%s1410_s5 + $0x6b8] sm:$0xff]  ;;  %v427_v37 = vld [vmem:[%s1410_s5 + $0x6c0] sm:$0xff]  ;;  %v673_v49 = vmul.f32 %v1435_v18, %v2474_v4  ;;  %v674_v50 = vmul.f32 %v1435_v18, %v2477_v5  ;;  %v684_v4 = vmul.f32 %v1435_v18, %v2531_v24 }
 0x114   : > { %900 = vst [vmem:[%s1475_s20 + $0x558] sm:$0xff] %v644_v51  ;;  %901 = vst [vmem:[%s1475_s20 + $0x560] sm:$0xff] %v645_v56  ;;  %v428_v38 = vld [vmem:[%s1410_s5 + $0x6c8] sm:$0xff]  ;;  %v429_v39 = vld [vmem:[%s1410_s5 + $0x6d0] sm:$0xff]  ;;  %v675_v51 = vmul.f32 %v1435_v18, %v2480_v6  ;;  %v689_v15 = vmul.f32 %v1435_v18, %v427_v37 }
 0x115   : > { %902 = vst [vmem:[%s1475_s20 + $0x568] sm:$0xff] %v646_v57  ;;  %903 = vst [vmem:[%s1475_s20 + $0x570] sm:$0xff] %v647_v58  ;;  %v430_v40 = vld [vmem:[%s1410_s5 + $0x6d8] sm:$0xff]  ;;  %v431_v45 = vld [vmem:[%s1410_s5 + $0x6e0] sm:$0xff]  ;;  %v677_v57 = vmul.f32 %v1435_v18, %v2498_v12  ;;  %v678_v58 = vmul.f32 %v1435_v18, %v2501_v13 }
 0x116   : > { %904 = vst [vmem:[%s1475_s20 + $0x578] sm:$0xff] %v648_v59  ;;  %905 = vst [vmem:[%s1475_s20 + $0x580] sm:$0xff] %v649_v0  ;;  %v432_v46 = vld [vmem:[%s1410_s5 + $0x6e8] sm:$0xff]  ;;  %v433_v47 = vld [vmem:[%s1410_s5 + $0x6f0] sm:$0xff]  ;;  %v679_v59 = vmul.f32 %v1435_v18, %v2504_v14 }
 0x117   : > { %906 = vst [vmem:[%s1475_s20 + $0x588] sm:$0xff] %v650_v1  ;;  %907 = vst [vmem:[%s1475_s20 + $0x590] sm:$0xff] %v651_v2  ;;  %v434_v48 = vld [vmem:[%s1410_s5 + $0x6f8] sm:$0xff]  ;;  %v435_v53 = vld [vmem:[%s1410_s5 + $0x700] sm:$0xff]  ;;  %v681_v1 = vmul.f32 %v1435_v18, %v2522_v21  ;;  %v682_v2 = vmul.f32 %v1435_v18, %v2525_v22  ;;  %v694_v24 = vmul.f32 %v1435_v18, %v432_v46 }
 0x118   : > { %908 = vst [vmem:[%s1475_s20 + $0x598] sm:$0xff] %v652_v3  ;;  %909 = vst [vmem:[%s1475_s20 + $0x5a0] sm:$0xff] %v653_v8  ;;  %v436_v54 = vld [vmem:[%s1410_s5 + $0x708] sm:$0xff]  ;;  %v437_v55 = vld [vmem:[%s1410_s5 + $0x710] sm:$0xff]  ;;  %v683_v3 = vmul.f32 %v1435_v18, %v2528_v23  ;;  %v685_v8 = vmul.f32 %v1435_v18, %v2546_v29  ;;  %v693_v23 = vmul.f32 %v1435_v18, %v431_v45 }
 0x119   : > { %910 = vst [vmem:[%s1475_s20 + $0x5a8] sm:$0xff] %v654_v9  ;;  %911 = vst [vmem:[%s1475_s20 + $0x5b0] sm:$0xff] %v655_v10  ;;  %v438_v56 = vld [vmem:[%s1410_s5 + $0x718] sm:$0xff]  ;;  %v439_v61 = vld [vmem:[%s1410_s5 + $0x720] sm:$0xff]  ;;  %v686_v9 = vmul.f32 %v1435_v18, %v2549_v30  ;;  %v687_v10 = vmul.f32 %v1435_v18, %v2552_v31  ;;  %v697_v30 = vmul.f32 %v1435_v18, %v435_v53 }
 0x11a   : > { %912 = vst [vmem:[%s1475_s20 + $0x5b8] sm:$0xff] %v656_v11  ;;  %913 = vst [vmem:[%s1475_s20 + $0x5c0] sm:$0xff] %v657_v16  ;;  %v440_v62 = vld [vmem:[%s1410_s5 + $0x728] sm:$0xff]  ;;  %v441_v63 = vld [vmem:[%s1410_s5 + $0x730] sm:$0xff]  ;;  %v688_v11 = vmul.f32 %v1435_v18, %v2555_v32  ;;  %v690_v16 = vmul.f32 %v1435_v18, %v428_v38  ;;  %v698_v31 = vmul.f32 %v1435_v18, %v436_v54 }
 0x11b   : > { %914 = vst [vmem:[%s1475_s20 + $0x5c8] sm:$0xff] %v658_v17  ;;  %915 = vst [vmem:[%s1475_s20 + $0x5d0] sm:$0xff] %v659_v19  ;;  %v442_v0 = vld [vmem:[%s1410_s5 + $0x738] sm:$0xff]  ;;  %v443_v5 = vld [vmem:[%s1410_s5 + $0x740] sm:$0xff]  ;;  %v691_v17 = vmul.f32 %v1435_v18, %v429_v39  ;;  %v692_v19 = vmul.f32 %v1435_v18, %v430_v40  ;;  %v699_v32 = vmul.f32 %v1435_v18, %v437_v55 }
 0x11c   : > { %916 = vst [vmem:[%s1475_s20 + $0x5d8] sm:$0xff] %v660_v20  ;;  %917 = vst [vmem:[%s1475_s20 + $0x5e0] sm:$0xff] %v661_v25  ;;  %v444_v6 = vld [vmem:[%s1410_s5 + $0x748] sm:$0xff]  ;;  %v445_v7 = vld [vmem:[%s1410_s5 + $0x750] sm:$0xff]  ;;  %v695_v25 = vmul.f32 %v1435_v18, %v433_v47  ;;  %v701_v37 = vmul.f32 %v1435_v18, %v439_v61  ;;  %v702_v38 = vmul.f32 %v1435_v18, %v440_v62 }
 0x11d   : > { %918 = vst [vmem:[%s1475_s20 + $0x5e8] sm:$0xff] %v662_v26  ;;  %919 = vst [vmem:[%s1475_s20 + $0x5f0] sm:$0xff] %v663_v27  ;;  %v446_v12 = vld [vmem:[%s1410_s5 + $0x758] sm:$0xff]  ;;  %v447_v13 = vld [vmem:[%s1410_s5 + $0x760] sm:$0xff]  ;;  %v696_v26 = vmul.f32 %v1435_v18, %v434_v48  ;;  %v703_v39 = vmul.f32 %v1435_v18, %v441_v63  ;;  %v704_v40 = vmul.f32 %v1435_v18, %v442_v0 }
 0x11e   : > { %920 = vst [vmem:[%s1475_s20 + $0x5f8] sm:$0xff] %v664_v28  ;;  %921 = vst [vmem:[%s1475_s20 + $0x600] sm:$0xff] %v665_v33  ;;  %v448_v14 = vld [vmem:[%s1410_s5 + $0x768] sm:$0xff]  ;;  %v449_v20 = vld [vmem:[%s1410_s5 + $0x770] sm:$0xff]  ;;  %v700_v33 = vmul.f32 %v1435_v18, %v438_v56  ;;  %v706_v45 = vmul.f32 %v1435_v18, %v444_v6  ;;  %v707_v46 = vmul.f32 %v1435_v18, %v445_v7 }
 0x11f   : > { %922 = vst [vmem:[%s1475_s20 + $0x608] sm:$0xff] %v666_v34  ;;  %923 = vst [vmem:[%s1475_s20 + $0x610] sm:$0xff] %v667_v35  ;;  %v450_v21 = vld [vmem:[%s1410_s5 + $0x778] sm:$0xff]  ;;  %v451_v22 = vld [vmem:[%s1410_s5 + $0x780] sm:$0xff]  ;;  %v708_v47 = vmul.f32 %v1435_v18, %v446_v12  ;;  %v711_v53 = vmul.f32 %v1435_v18, %v449_v20 }
 0x120   : > { %924 = vst [vmem:[%s1475_s20 + $0x618] sm:$0xff] %v668_v36  ;;  %925 = vst [vmem:[%s1475_s20 + $0x620] sm:$0xff] %v669_v41  ;;  %v452_v27 = vld [vmem:[%s1410_s5 + $0x788] sm:$0xff]  ;;  %v453_v28 = vld [vmem:[%s1410_s5 + $0x790] sm:$0xff]  ;;  %v712_v54 = vmul.f32 %v1435_v18, %v450_v21 }
 0x121   : > { %926 = vst [vmem:[%s1475_s20 + $0x628] sm:$0xff] %v670_v42  ;;  %927 = vst [vmem:[%s1475_s20 + $0x630] sm:$0xff] %v671_v43  ;;  %v454_v29 = vld [vmem:[%s1410_s5 + $0x798] sm:$0xff]  ;;  %v455_v34 = vld [vmem:[%s1410_s5 + $0x7a0] sm:$0xff] }
 0x122   : > { %928 = vst [vmem:[%s1475_s20 + $0x638] sm:$0xff] %v672_v44  ;;  %929 = vst [vmem:[%s1475_s20 + $0x640] sm:$0xff] %v673_v49  ;;  %v456_v35 = vld [vmem:[%s1410_s5 + $0x7a8] sm:$0xff]  ;;  %v457_v36 = vld [vmem:[%s1410_s5 + $0x7b0] sm:$0xff]  ;;  %v705_v44 = vmul.f32 %v1435_v18, %v443_v5  ;;  %v716_v61 = vmul.f32 %v1435_v18, %v454_v29  ;;  %v717_v62 = vmul.f32 %v1435_v18, %v455_v34 }
 0x123   : > { %930 = vst [vmem:[%s1475_s20 + $0x648] sm:$0xff] %v674_v50  ;;  %931 = vst [vmem:[%s1475_s20 + $0x650] sm:$0xff] %v675_v51  ;;  %v458_v41 = vld [vmem:[%s1410_s5 + $0x7b8] sm:$0xff]  ;;  %v459_v42 = vld [vmem:[%s1410_s5 + $0x7c0] sm:$0xff]  ;;  %v709_v51 = vmul.f32 %v1435_v18, %v447_v13  ;;  %v718_v63 = vmul.f32 %v1435_v18, %v456_v35  ;;  %v719_v0 = vmul.f32 %v1435_v18, %v457_v36 }
 0x124   : > { %932 = vst [vmem:[%s1475_s20 + $0x658] sm:$0xff] %v676_v52  ;;  %933 = vst [vmem:[%s1475_s20 + $0x660] sm:$0xff] %v677_v57  ;;  %v460_v43 = vld [vmem:[%s1410_s5 + $0x7c8] sm:$0xff]  ;;  %v461_v48 = vld [vmem:[%s1410_s5 + $0x7d0] sm:$0xff]  ;;  %v710_v52 = vmul.f32 %v1435_v18, %v448_v14 }
 0x125   : > { %934 = vst [vmem:[%s1475_s20 + $0x668] sm:$0xff] %v678_v58  ;;  %935 = vst [vmem:[%s1475_s20 + $0x670] sm:$0xff] %v679_v59  ;;  %v462_v49 = vld [vmem:[%s1410_s5 + $0x7d8] sm:$0xff]  ;;  %v463_v50 = vld [vmem:[%s1410_s5 + $0x7e0] sm:$0xff]  ;;  %v713_v58 = vmul.f32 %v1435_v18, %v451_v22  ;;  %v714_v59 = vmul.f32 %v1435_v18, %v452_v27 }
 0x126   : > { %936 = vst [vmem:[%s1475_s20 + $0x678] sm:$0xff] %v680_v60  ;;  %937 = vst [vmem:[%s1475_s20 + $0x680] sm:$0xff] %v681_v1  ;;  %v464_v55 = vld [vmem:[%s1410_s5 + $0x7e8] sm:$0xff]  ;;  %v465_v56 = vld [vmem:[%s1410_s5 + $0x7f0] sm:$0xff]  ;;  %v715_v60 = vmul.f32 %v1435_v18, %v453_v28  ;;  %v720_v1 = vmul.f32 %v1435_v18, %v458_v41  ;;  %v724_v5 = vmul.f32 %v1435_v18, %v462_v49 }
 0x127   : > { %938 = vst [vmem:[%s1475_s20 + $0x688] sm:$0xff] %v682_v2  ;;  %939 = vst [vmem:[%s1475_s20 + $0x690] sm:$0xff] %v683_v3  ;;  %v466_v57 = vld [vmem:[%s1410_s5 + $0x7f8] sm:$0xff]  ;;  %v721_v2 = vmul.f32 %v1435_v18, %v459_v42  ;;  %v722_v3 = vmul.f32 %v1435_v18, %v460_v43  ;;  %v725_v6 = vmul.f32 %v1435_v18, %v463_v50 }
 0x128   : > { %940 = vst [vmem:[%s1475_s20 + $0x698] sm:$0xff] %v684_v4  ;;  %941 = vst [vmem:[%s1475_s20 + $0x6a0] sm:$0xff] %v685_v8  ;;  %v723_v4 = vmul.f32 %v1435_v18, %v461_v48  ;;  %v726_v7 = vmul.f32 %v1435_v18, %v464_v55  ;;  %v727_v8 = vmul.f32 %v1435_v18, %v465_v56 }
 0x129   : > { %942 = vst [vmem:[%s1475_s20 + $0x6a8] sm:$0xff] %v686_v9  ;;  %943 = vst [vmem:[%s1475_s20 + $0x6b0] sm:$0xff] %v687_v10  ;;  %v728_v9 = vmul.f32 %v1435_v18, %v466_v57 }
 0x12a   : > { %944 = vst [vmem:[%s1475_s20 + $0x6b8] sm:$0xff] %v688_v11  ;;  %945 = vst [vmem:[%s1475_s20 + $0x6c0] sm:$0xff] %v689_v15 }
 0x12b   : > { %946 = vst [vmem:[%s1475_s20 + $0x6c8] sm:$0xff] %v690_v16  ;;  %947 = vst [vmem:[%s1475_s20 + $0x6d0] sm:$0xff] %v691_v17 }
 0x12c   : > { %948 = vst [vmem:[%s1475_s20 + $0x6d8] sm:$0xff] %v692_v19  ;;  %949 = vst [vmem:[%s1475_s20 + $0x6e0] sm:$0xff] %v693_v23 }
 0x12d   : > { %950 = vst [vmem:[%s1475_s20 + $0x6e8] sm:$0xff] %v694_v24  ;;  %951 = vst [vmem:[%s1475_s20 + $0x6f0] sm:$0xff] %v695_v25 }
 0x12e   : > { %952 = vst [vmem:[%s1475_s20 + $0x6f8] sm:$0xff] %v696_v26  ;;  %953 = vst [vmem:[%s1475_s20 + $0x700] sm:$0xff] %v697_v30 }
 0x12f   : > { %954 = vst [vmem:[%s1475_s20 + $0x708] sm:$0xff] %v698_v31  ;;  %955 = vst [vmem:[%s1475_s20 + $0x710] sm:$0xff] %v699_v32 }
 0x130   : > { %956 = vst [vmem:[%s1475_s20 + $0x718] sm:$0xff] %v700_v33  ;;  %957 = vst [vmem:[%s1475_s20 + $0x720] sm:$0xff] %v701_v37 }
 0x131   : > { %958 = vst [vmem:[%s1475_s20 + $0x728] sm:$0xff] %v702_v38  ;;  %959 = vst [vmem:[%s1475_s20 + $0x730] sm:$0xff] %v703_v39 }
 0x132   : > { %960 = vst [vmem:[%s1475_s20 + $0x738] sm:$0xff] %v704_v40  ;;  %961 = vst [vmem:[%s1475_s20 + $0x740] sm:$0xff] %v705_v44 }
 0x133   : > { %962 = vst [vmem:[%s1475_s20 + $0x748] sm:$0xff] %v706_v45  ;;  %963 = vst [vmem:[%s1475_s20 + $0x750] sm:$0xff] %v707_v46 }
 0x134   : > { %964 = vst [vmem:[%s1475_s20 + $0x758] sm:$0xff] %v708_v47  ;;  %965 = vst [vmem:[%s1475_s20 + $0x760] sm:$0xff] %v709_v51 }
 0x135   : > { %966 = vst [vmem:[%s1475_s20 + $0x768] sm:$0xff] %v710_v52  ;;  %967 = vst [vmem:[%s1475_s20 + $0x770] sm:$0xff] %v711_v53 }
 0x136   : > { %968 = vst [vmem:[%s1475_s20 + $0x778] sm:$0xff] %v712_v54  ;;  %969 = vst [vmem:[%s1475_s20 + $0x780] sm:$0xff] %v713_v58 }
 0x137   : > { %970 = vst [vmem:[%s1475_s20 + $0x788] sm:$0xff] %v714_v59  ;;  %971 = vst [vmem:[%s1475_s20 + $0x790] sm:$0xff] %v715_v60 }
 0x138   : > { %972 = vst [vmem:[%s1475_s20 + $0x798] sm:$0xff] %v716_v61  ;;  %973 = vst [vmem:[%s1475_s20 + $0x7a0] sm:$0xff] %v717_v62 }
 0x139   : > { %974 = vst [vmem:[%s1475_s20 + $0x7a8] sm:$0xff] %v718_v63  ;;  %975 = vst [vmem:[%s1475_s20 + $0x7b0] sm:$0xff] %v719_v0 }
 0x13a   : > { %976 = vst [vmem:[%s1475_s20 + $0x7b8] sm:$0xff] %v720_v1  ;;  %977 = vst [vmem:[%s1475_s20 + $0x7c0] sm:$0xff] %v721_v2  ;;  %992 = sbr.rel (!%p1363_p9) target bundleno = 345 (0x159), region = 36 }
 0x13b   : > { %978 = vst [vmem:[%s1475_s20 + $0x7c8] sm:$0xff] %v722_v3  ;;  %979 = vst [vmem:[%s1475_s20 + $0x7d0] sm:$0xff] %v723_v4 }
 0x13c   : > { %980 = vst [vmem:[%s1475_s20 + $0x7d8] sm:$0xff] %v724_v5  ;;  %981 = vst [vmem:[%s1475_s20 + $0x7e0] sm:$0xff] %v725_v6 }
 0x13d   : > { %982 = vst [vmem:[%s1475_s20 + $0x7e8] sm:$0xff] %v726_v7  ;;  %983 = vst [vmem:[%s1475_s20 + $0x7f0] sm:$0xff] %v727_v8 }
 0x13e   : > { %984 = vst [vmem:[%s1475_s20 + $0x7f8] sm:$0xff] %v728_v9 }
 0x13f   : > { %s2827_s8 = smov (!%p995_p8, %s994_s8), 256 }
 0x140   : > { %s2761_s15 = sshll.u32 %s2827_s8, 7 }
 0x141   : > { %s999_s16 = ssub.s32 32768, %s2761_s15 }
 0x142   : > { %1000 = vsyncadd %s986_s6, %s999_s16  ;;  %p1125_p0 = scmp.ne.s32.totalorder %s2761_s15, 0  ;;  %s1132_s21 = sshll.u32 %s1288_s12, 15 }
 0x143   : > { %s1005_s24 = scalar_lea.hbm %s2813_s2, %s1132_s21  ;;  %s1008_s25 = sshll.u32 %s1475_s20, 4  ;;  %s1009_s25 = int_to_ptr.vmem [resolvable:$true] %s1008_s25 }
 0x144   : > { %s1216_s26 = scalar_lea.vmem %s1009_s25, %s2761_s15  ;;  %s1300_s27 = smov [#allocation5]  }
 0x145   : > { %p1217_p9 = scmp.ne.s32.totalorder %s1009_s25, %s1216_s26  ;;  %s1220_s3 = sshll.u32 %s1300_s27, 4  ;;  %s1221_s3 = int_to_ptr.vmem [resolvable:$false] %s1220_s3 }
 0x146   : > { %s1222_s4 = scalar_lea.vmem %s1221_s3, 65536  ;;  %p1223_p10 = scmp.lt.s32.totalorder %s1009_s25, %s1221_s3 }
 0x147   : > { %p1218_p6 = pnand %p1217_p9, %p1125_p0  ;;  %p1224_p12 = scmp.lt.s32.totalorder %s1222_s4, %s1216_s26 }
 0x149   : > { %p1219_p7 = pneg %p1218_p6  ;;  %p1225_p13 = por %p1224_p12, %p1223_p10 }
 0x14b   : > { %p1226_p1 = pnand %p1225_p13, %p1219_p7 }
 0x14d   : > { %1229 = shalt.err (!%p1226_p1)
}
 0x14e   : > { %s1230_s12 = scalar_lea.hbm %s1005_s24, %s2761_s15  ;;  %s1234_s30 = scalar_lea.hbm %s2813_s2, 151296 }
 0x14f   : > { %p1231_p2 = scmp.ne.s32.totalorder %s1005_s24, %s1230_s12  ;;  %p1235_p5 = scmp.lt.s32.totalorder %s1005_s24, %s2813_s2 }
 0x150   : > { %p1236_p8 = scmp.lt.s32.totalorder %s1234_s30, %s1230_s12 }
 0x151   : > { %p1232_p3 = pnand %p1231_p2, %p1125_p0 }
 0x152   : > { %p1237_p9 = por %p1236_p8, %p1235_p5 }
 0x153   : > { %p1233_p4 = pneg %p1232_p3 }
 0x155   : > { %p1238_p6 = pnand %p1237_p9, %p1233_p4 }
 0x157   : > { %1241 = shalt.err (!%p1238_p6)
}
 0x158   : > { %1011 = dma.vmem_to_hbm [thread:$0]  (%p1125_p0), %s1009_s25, %s2761_s15, %s1005_s24, %s986_s6  }
 0x159 PF: > { %p1139_p7 = scmp.ge.s32.totalorder %s1296_s14, 2  ;;  %s1020_s8 = sand.u32 1, %s1276_s9  }
 0x15a   : > { %s1021_s16 = scalar_lea.sflag [#allocation4], %s1020_s8 }
 0x15b   : > { %p1136_p10 = pnand %p1139_p7, %p1370_p11 }
 0x15d   : > { %p1137_p12 = pneg %p1136_p10 }
 0x15f   : > { %1271 = dma.done.wait (%p1137_p12), %s1021_s16, 32768  }
 0x160   : > { %1273 = vsyncadd (%p1137_p12), %s1021_s16, 4294934528  ;;  %s18_s14 = sadd.s32 1, %s1296_s14   ;;  %s2817_s9 = smov %s1280_s10 }
 0x161   : > { %p15_p13 = scmp.ge.s32.totalorder %s18_s14, 7   ;;  %s2818_s10 = smov %s1284_s11 }
 0x162   : > { %s2819_s11 = smov %s1368_s22  ;;  %s2820_s12 = smov %s1292_s13 }
 0x163   : > { %s2821_s13 = smov %s2823_s17  ;;  %17 = sbr.rel (!%p15_p13) target bundleno = 6 (0x6), region = 76 }
 0x168   :  { %1026 = vsyncpa [#allocation3], 1 }
 0x169   :  { %1028 = vsyncpa [#allocation3 + $0x1], 1 }
 0x16a   :  { %1029 = vsyncpa [#allocation4], 1 }
 0x16b   :  { %1031 = vsyncpa [#allocation4 + $0x1], 1 }

</bundles_post_ra>
